<compile_context>
chip_gen: v5e
topology: v5e:2x2
jax: 0.10.0
libtpu: 0.0.40
codegen_flags: <defaults>
</compile_context>

<pallas_src>
import functools

import jax
import jax.numpy as jnp
from jax.experimental import pallas as pl
from jax.experimental.pallas import tpu as pltpu


def _round_up(v, m):
    return (v + m - 1) // m * m


def spatial_attention(x, weight):
    """x: (N, C, H, W) f32; weight: (1, 2, K, K) f32 -> (N, 1, H, W) f32."""
    N, C, H, W = x.shape
    K = weight.shape[-1]
    assert weight.shape == (1, 2, K, K)
    PAD = (K - 1) // 2                    # 3 for K=7, 1 for K=3 (as in the module)
    L = H * W                             # flattened spatial length (lane dim)
    PAD_FLAT = PAD * W + PAD              # flat-index reach of a corner tap
    F = _round_up(PAD_FLAT, 128)          # 128-aligned front border of scratch
    LEX = _round_up(F + L + PAD_FLAT, 128)

    # Batch elements per grid step. Block second-minor dim must be divisible
    # by 8 or equal the full dim.
    if N <= 8:
        NB = N
    elif N % 8 == 0:
        NB = 8
    else:
        NB = N                            # single full block; still legal

    def kernel(w_ref, x_ref, o_ref, pad_ref):
        # w_ref  : (2*K*K,) f32 in SMEM   (flattened OIHW conv weight, O=1)
        # x_ref  : (NB, C*L) f32 in VMEM  (NB batch elements, channels on lanes)
        # o_ref  : (NB, L)   f32 in VMEM
        # pad_ref: (2, NB, LEX) f32 VMEM scratch (flat, zero-bordered pooled maps)

        # ---- single-pass channel pooling with 2 partial accumulators ----
        sums = [None, None]
        maxs = [None, None]
        for c in range(C):
            v = x_ref[:, c * L:(c + 1) * L]          # aligned lane slice (NB, L)
            i = c & 1
            sums[i] = v if sums[i] is None else sums[i] + v
            maxs[i] = v if maxs[i] is None else jnp.maximum(maxs[i], v)
        sum_all = functools.reduce(lambda a, b: a + b,
                                   [s for s in sums if s is not None])
        max_all = functools.reduce(jnp.maximum,
                                   [m for m in maxs if m is not None])
        avg_all = sum_all * (1.0 / C)

        # ---- build zero-bordered flat planes (dense, aligned stores only) ----
        # Borders are tiny and rewritten each step so correctness never relies
        # on scratch persistence (safe with "parallel" core sharding).
        pad_ref[:, :, 0:F] = jnp.zeros((2, NB, F), jnp.float32)
        pad_ref[:, :, F + L:LEX] = jnp.zeros((2, NB, LEX - F - L), jnp.float32)
        pad_ref[0, :, F:F + L] = avg_all
        pad_ref[1, :, F:F + L] = max_all

        # ---- KxK conv as 2*K*K shifted lane-dense FMAs + K column masks ----
        col = jax.lax.broadcasted_iota(jnp.int32, (1, L), 1) % W
        acc = jnp.zeros((NB, L), jnp.float32)
        for kx in range(-PAD, PAD + 1):
            # columns whose horizontal neighbour x+kx lies inside [0, W)
            valid = jnp.logical_and(col + kx >= 0, col + kx <= W - 1)
            part0 = jnp.zeros((NB, L), jnp.float32)   # per-channel partials
            part1 = jnp.zeros((NB, L), jnp.float32)   # (break the add chain)
            for ky in range(-PAD, PAD + 1):
                start = F + ky * W + kx               # static, in-bounds by LEX
                widx = (ky + PAD) * K + (kx + PAD)
                part0 = part0 + w_ref[widx] * pad_ref[0, :, start:start + L]
                part1 = part1 + w_ref[K * K + widx] * pad_ref[1, :, start:start + L]
            acc = acc + jnp.where(valid, part0 + part1, 0.0)

        o_ref[...] = jax.nn.sigmoid(acc)

    x_flat = x.reshape(N, C * L).astype(jnp.float32)      # free collapse, lane-dense
    w_flat = weight.reshape(-1).astype(jnp.float32)       # (2*K*K,)

    out_flat = pl.pallas_call(
        kernel,
        out_shape=jax.ShapeDtypeStruct((N, L), jnp.float32),
        grid_spec=pltpu.PrefetchScalarGridSpec(
            num_scalar_prefetch=0,
            grid=(N // NB,),
            in_specs=[
                # conv weight: whole array, scalar-indexed from SMEM
                pl.BlockSpec(memory_space=pltpu.MemorySpace.SMEM),
                # NB batch elements per step, all channels along lanes
                pl.BlockSpec((NB, C * L), lambda n: (n, 0)),
            ],
            out_specs=pl.BlockSpec((NB, L), lambda n: (n, 0)),
            scratch_shapes=[pltpu.VMEM((2, NB, LEX), jnp.float32)],
        ),
        compiler_params=pltpu.CompilerParams(
            # batch blocks are independent -> shard over v7x's 2 TensorCores
            dimension_semantics=("parallel",),
        ),
    )(w_flat, x_flat)

    return out_flat.reshape(N, 1, H, W)


if __name__ == "__main__":
    key = jax.random.PRNGKey(0)
    kx_key, kw_key = jax.random.split(key)

    N, C, H, W = 2, 4, 16, 16
    KSIZE = 7
    PAD = 3
    x = jax.random.normal(kx_key, (N, C, H, W), dtype=jnp.float32)

    # Deterministic Conv2d(2, 1, 7, padding=3, bias=False) weight
    # (kaiming-uniform-style bound, like PyTorch's default init).
    fan_in = 2 * KSIZE * KSIZE
    bound = 1.0 / float(fan_in) ** 0.5
    weight = jax.random.uniform(
        kw_key, (1, 2, KSIZE, KSIZE), dtype=jnp.float32, minval=-bound, maxval=bound
    )

    out = spatial_attention(x, weight)
    out = jax.block_until_ready(out)

    # Pure-JAX reference of the PyTorch forward pass.
    avg_ref = jnp.mean(x, axis=1, keepdims=True)
    max_ref = jnp.max(x, axis=1, keepdims=True)
    x1 = jnp.concatenate([avg_ref, max_ref], axis=1)
    conv_ref = jax.lax.conv_general_dilated(
        x1, weight, window_strides=(1, 1),
        padding=[(PAD, PAD), (PAD, PAD)],
        dimension_numbers=("NCHW", "OIHW", "NCHW"),
    )
    ref = jax.nn.sigmoid(conv_ref)

    assert out.shape == (N, 1, H, W)
    assert jnp.allclose(out, ref, atol=1e-5, rtol=1e-5), float(
        jnp.max(jnp.abs(out - ref)))
    print("KERNEL_OK")
</pallas_src>

<mosaic_0001>
module attributes {stable_mosaic.version = 11 : i64} {
  func.func @kernel(%arg0: i32, %arg1: memref<98xf32, #tpu.memory_space<smem>>, %arg2: memref<2x1024xf32, #tpu.memory_space<vmem>>, %arg3: memref<2x256xf32, #tpu.memory_space<vmem>>, %arg4: memref<2x2x512xf32, #tpu.memory_space<vmem>>) attributes {dimension_semantics = [#tpu.dimension_semantics<parallel>], iteration_bounds = array<i64: 1>, scalar_prefetch = 0 : i64, scratch_operands = 1 : i64, tpu.core_type = #tpu.core_type<tc>, window_params = [{transform_indices = @transform_0, window_bounds = array<i64: 98>}, {transform_indices = @transform_1, window_bounds = array<i64: 2, 1024>}, {transform_indices = @transform_2, window_bounds = array<i64: 2, 256>}]} {
    %c0 = arith.constant 0 : index
    %c0_0 = arith.constant 0 : index
    %0 = vector.load %arg2[%c0, %c0_0] : memref<2x1024xf32, #tpu.memory_space<vmem>>, vector<2x256xf32>
    %c0_1 = arith.constant 0 : index
    %c256 = arith.constant 256 : index
    %1 = vector.load %arg2[%c0_1, %c256] : memref<2x1024xf32, #tpu.memory_space<vmem>>, vector<2x256xf32>
    %c0_2 = arith.constant 0 : index
    %c512 = arith.constant 512 : index
    %2 = vector.load %arg2[%c0_2, %c512] : memref<2x1024xf32, #tpu.memory_space<vmem>>, vector<2x256xf32>
    %3 = arith.addf %0, %2 : vector<2x256xf32>
    %4 = arith.maximumf %0, %2 : vector<2x256xf32>
    %c0_3 = arith.constant 0 : index
    %c768 = arith.constant 768 : index
    %5 = vector.load %arg2[%c0_3, %c768] : memref<2x1024xf32, #tpu.memory_space<vmem>>, vector<2x256xf32>
    %6 = arith.addf %1, %5 : vector<2x256xf32>
    %7 = arith.maximumf %1, %5 : vector<2x256xf32>
    %8 = arith.addf %3, %6 : vector<2x256xf32>
    %9 = arith.maximumf %4, %7 : vector<2x256xf32>
    %cst = arith.constant 2.500000e-01 : f32
    %10 = vector.broadcast %cst : f32 to vector<2x256xf32>
    %11 = arith.mulf %8, %10 : vector<2x256xf32>
    %cst_4 = arith.constant 0.000000e+00 : f32
    %12 = vector.broadcast %cst_4 : f32 to vector<2x2x128xf32>
    %c0_5 = arith.constant 0 : index
    %c0_6 = arith.constant 0 : index
    %c0_7 = arith.constant 0 : index
    %13 = vector.load %arg4[%c0_5, %c0_6, %c0_7] : memref<2x2x512xf32, #tpu.memory_space<vmem>>, vector<2x2x128xf32>
    tpu.vector_store %arg4[%c0_5, %c0_6, %c0_7], %12 {strides = array<i32>} : memref<2x2x512xf32, #tpu.memory_space<vmem>>, vector<2x2x128xf32>,
    %cst_8 = arith.constant 0.000000e+00 : f32
    %14 = vector.broadcast %cst_8 : f32 to vector<2x2x128xf32>
    %c0_9 = arith.constant 0 : index
    %c0_10 = arith.constant 0 : index
    %c384 = arith.constant 384 : index
    %15 = vector.load %arg4[%c0_9, %c0_10, %c384] : memref<2x2x512xf32, #tpu.memory_space<vmem>>, vector<2x2x128xf32>
    tpu.vector_store %arg4[%c0_9, %c0_10, %c384], %14 {strides = array<i32>} : memref<2x2x512xf32, #tpu.memory_space<vmem>>, vector<2x2x128xf32>,
    %c0_11 = arith.constant 0 : index
    %c0_12 = arith.constant 0 : index
    %c128 = arith.constant 128 : index
    %16 = vector.load %arg4[%c0_11, %c0_12, %c128] : memref<2x2x512xf32, #tpu.memory_space<vmem>>, vector<1x2x256xf32>
    %17 = vector.shape_cast %16 : vector<1x2x256xf32> to vector<2x256xf32>
    %18 = vector.shape_cast %11 : vector<2x256xf32> to vector<1x2x256xf32>
    tpu.vector_store %arg4[%c0_11, %c0_12, %c128], %18 {strides = array<i32>} : memref<2x2x512xf32, #tpu.memory_space<vmem>>, vector<1x2x256xf32>,
    %c1 = arith.constant 1 : index
    %c0_13 = arith.constant 0 : index
    %c128_14 = arith.constant 128 : index
    %19 = vector.load %arg4[%c1, %c0_13, %c128_14] : memref<2x2x512xf32, #tpu.memory_space<vmem>>, vector<1x2x256xf32>
    %20 = vector.shape_cast %19 : vector<1x2x256xf32> to vector<2x256xf32>
    %21 = vector.shape_cast %9 : vector<2x256xf32> to vector<1x2x256xf32>
    tpu.vector_store %arg4[%c1, %c0_13, %c128_14], %21 {strides = array<i32>} : memref<2x2x512xf32, #tpu.memory_space<vmem>>, vector<1x2x256xf32>,
    %22 = tpu.iota {dimensions = array<i32: 1>} : vector<1x256xi32>
    %c16_i32 = arith.constant 16 : i32
    %c0_i32 = arith.constant 0 : i32
    %23 = arith.cmpi eq, %c16_i32, %c0_i32 : i32
    %c1_i32 = arith.constant 1 : i32
    %24 = arith.select %23, %c1_i32, %c16_i32 : i32
    %25 = vector.broadcast %24 : i32 to vector<1x256xi32>
    %26 = arith.remsi %22, %25 : vector<1x256xi32>
    %c0_i32_15 = arith.constant 0 : i32
    %27 = vector.broadcast %c0_i32_15 : i32 to vector<1x256xi32>
    %28 = arith.cmpi ne, %26, %27 : vector<1x256xi32>
    %c0_i32_16 = arith.constant 0 : i32
    %29 = vector.broadcast %c0_i32_16 : i32 to vector<1x256xi32>
    %30 = arith.cmpi slt, %26, %29 : vector<1x256xi32>
    %c0_i32_17 = arith.constant 0 : i32
    %31 = arith.cmpi slt, %24, %c0_i32_17 : i32
    %32 = vector.broadcast %31 : i1 to vector<1x256xi1>
    %33 = vector.broadcast %32 : vector<1x256xi1> to vector<1x256xi1>
    %34 = arith.xori %30, %33 : vector<1x256xi1>
    %35 = arith.andi %34, %28 : vector<1x256xi1>
    %36 = vector.broadcast %24 : i32 to vector<1x256xi32>
    %37 = arith.addi %26, %36 : vector<1x256xi32>
    %38 = arith.select %35, %37, %26 : vector<1x256xi1>, vector<1x256xi32>
    %cst_18 = arith.constant 0.000000e+00 : f32
    %39 = vector.broadcast %cst_18 : f32 to vector<2x256xf32>
    %c-3_i32 = arith.constant -3 : i32
    %40 = vector.broadcast %c-3_i32 : i32 to vector<1x256xi32>
    %41 = arith.addi %38, %40 : vector<1x256xi32>
    %c0_i32_19 = arith.constant 0 : i32
    %42 = vector.broadcast %c0_i32_19 : i32 to vector<1x256xi32>
    %43 = arith.cmpi sge, %41, %42 : vector<1x256xi32>
    %c-3_i32_20 = arith.constant -3 : i32
    %44 = vector.broadcast %c-3_i32_20 : i32 to vector<1x256xi32>
    %45 = arith.addi %38, %44 : vector<1x256xi32>
    %c15_i32 = arith.constant 15 : i32
    %46 = vector.broadcast %c15_i32 : i32 to vector<1x256xi32>
    %47 = arith.cmpi sle, %45, %46 : vector<1x256xi32>
    %48 = arith.andi %43, %47 : vector<1x256xi1>
    %cst_21 = arith.constant 0.000000e+00 : f32
    %49 = vector.broadcast %cst_21 : f32 to vector<2x256xf32>
    %cst_22 = arith.constant 0.000000e+00 : f32
    %50 = vector.broadcast %cst_22 : f32 to vector<2x256xf32>
    %c0_23 = arith.constant 0 : index
    %51 = memref.load %arg1[%c0_23] : memref<98xf32, #tpu.memory_space<smem>>
    %c0_24 = arith.constant 0 : index
    %c0_25 = arith.constant 0 : index
    %c77 = arith.constant 77 : index
    %52 = vector.load %arg4[%c0_24, %c0_25, %c77] : memref<2x2x512xf32, #tpu.memory_space<vmem>>, vector<1x2x256xf32>
    %53 = vector.shape_cast %52 : vector<1x2x256xf32> to vector<2x256xf32>
    %54 = vector.broadcast %51 : f32 to vector<2x256xf32>
    %55 = arith.mulf %54, %53 : vector<2x256xf32>
    %56 = arith.addf %49, %55 : vector<2x256xf32>
    %c49 = arith.constant 49 : index
    %57 = memref.load %arg1[%c49] : memref<98xf32, #tpu.memory_space<smem>>
    %c1_26 = arith.constant 1 : index
    %c0_27 = arith.constant 0 : index
    %c77_28 = arith.constant 77 : index
    %58 = vector.load %arg4[%c1_26, %c0_27, %c77_28] : memref<2x2x512xf32, #tpu.memory_space<vmem>>, vector<1x2x256xf32>
    %59 = vector.shape_cast %58 : vector<1x2x256xf32> to vector<2x256xf32>
    %60 = vector.broadcast %57 : f32 to vector<2x256xf32>
    %61 = arith.mulf %60, %59 : vector<2x256xf32>
    %62 = arith.addf %50, %61 : vector<2x256xf32>
    %c7 = arith.constant 7 : index
    %63 = memref.load %arg1[%c7] : memref<98xf32, #tpu.memory_space<smem>>
    %c0_29 = arith.constant 0 : index
    %c0_30 = arith.constant 0 : index
    %c93 = arith.constant 93 : index
    %64 = vector.load %arg4[%c0_29, %c0_30, %c93] : memref<2x2x512xf32, #tpu.memory_space<vmem>>, vector<1x2x256xf32>
    %65 = vector.shape_cast %64 : vector<1x2x256xf32> to vector<2x256xf32>
    %66 = vector.broadcast %63 : f32 to vector<2x256xf32>
    %67 = arith.mulf %66, %65 : vector<2x256xf32>
    %68 = arith.addf %56, %67 : vector<2x256xf32>
    %c56 = arith.constant 56 : index
    %69 = memref.load %arg1[%c56] : memref<98xf32, #tpu.memory_space<smem>>
    %c1_31 = arith.constant 1 : index
    %c0_32 = arith.constant 0 : index
    %c93_33 = arith.constant 93 : index
    %70 = vector.load %arg4[%c1_31, %c0_32, %c93_33] : memref<2x2x512xf32, #tpu.memory_space<vmem>>, vector<1x2x256xf32>
    %71 = vector.shape_cast %70 : vector<1x2x256xf32> to vector<2x256xf32>
    %72 = vector.broadcast %69 : f32 to vector<2x256xf32>
    %73 = arith.mulf %72, %71 : vector<2x256xf32>
    %74 = arith.addf %62, %73 : vector<2x256xf32>
    %c14 = arith.constant 14 : index
    %75 = memref.load %arg1[%c14] : memref<98xf32, #tpu.memory_space<smem>>
    %c0_34 = arith.constant 0 : index
    %c0_35 = arith.constant 0 : index
    %c109 = arith.constant 109 : index
    %76 = vector.load %arg4[%c0_34, %c0_35, %c109] : memref<2x2x512xf32, #tpu.memory_space<vmem>>, vector<1x2x256xf32>
    %77 = vector.shape_cast %76 : vector<1x2x256xf32> to vector<2x256xf32>
    %78 = vector.broadcast %75 : f32 to vector<2x256xf32>
    %79 = arith.mulf %78, %77 : vector<2x256xf32>
    %80 = arith.addf %68, %79 : vector<2x256xf32>
    %c63 = arith.constant 63 : index
    %81 = memref.load %arg1[%c63] : memref<98xf32, #tpu.memory_space<smem>>
    %c1_36 = arith.constant 1 : index
    %c0_37 = arith.constant 0 : index
    %c109_38 = arith.constant 109 : index
    %82 = vector.load %arg4[%c1_36, %c0_37, %c109_38] : memref<2x2x512xf32, #tpu.memory_space<vmem>>, vector<1x2x256xf32>
    %83 = vector.shape_cast %82 : vector<1x2x256xf32> to vector<2x256xf32>
    %84 = vector.broadcast %81 : f32 to vector<2x256xf32>
    %85 = arith.mulf %84, %83 : vector<2x256xf32>
    %86 = arith.addf %74, %85 : vector<2x256xf32>
    %c21 = arith.constant 21 : index
    %87 = memref.load %arg1[%c21] : memref<98xf32, #tpu.memory_space<smem>>
    %c0_39 = arith.constant 0 : index
    %c0_40 = arith.constant 0 : index
    %c125 = arith.constant 125 : index
    %88 = vector.load %arg4[%c0_39, %c0_40, %c125] : memref<2x2x512xf32, #tpu.memory_space<vmem>>, vector<1x2x256xf32>
    %89 = vector.shape_cast %88 : vector<1x2x256xf32> to vector<2x256xf32>
    %90 = vector.broadcast %87 : f32 to vector<2x256xf32>
    %91 = arith.mulf %90, %89 : vector<2x256xf32>
    %92 = arith.addf %80, %91 : vector<2x256xf32>
    %c70 = arith.constant 70 : index
    %93 = memref.load %arg1[%c70] : memref<98xf32, #tpu.memory_space<smem>>
    %c1_41 = arith.constant 1 : index
    %c0_42 = arith.constant 0 : index
    %c125_43 = arith.constant 125 : index
    %94 = vector.load %arg4[%c1_41, %c0_42, %c125_43] : memref<2x2x512xf32, #tpu.memory_space<vmem>>, vector<1x2x256xf32>
    %95 = vector.shape_cast %94 : vector<1x2x256xf32> to vector<2x256xf32>
    %96 = vector.broadcast %93 : f32 to vector<2x256xf32>
    %97 = arith.mulf %96, %95 : vector<2x256xf32>
    %98 = arith.addf %86, %97 : vector<2x256xf32>
    %c28 = arith.constant 28 : index
    %99 = memref.load %arg1[%c28] : memref<98xf32, #tpu.memory_space<smem>>
    %c0_44 = arith.constant 0 : index
    %c0_45 = arith.constant 0 : index
    %c141 = arith.constant 141 : index
    %100 = vector.load %arg4[%c0_44, %c0_45, %c141] : memref<2x2x512xf32, #tpu.memory_space<vmem>>, vector<1x2x256xf32>
    %101 = vector.shape_cast %100 : vector<1x2x256xf32> to vector<2x256xf32>
    %102 = vector.broadcast %99 : f32 to vector<2x256xf32>
    %103 = arith.mulf %102, %101 : vector<2x256xf32>
    %104 = arith.addf %92, %103 : vector<2x256xf32>
    %c77_46 = arith.constant 77 : index
    %105 = memref.load %arg1[%c77_46] : memref<98xf32, #tpu.memory_space<smem>>
    %c1_47 = arith.constant 1 : index
    %c0_48 = arith.constant 0 : index
    %c141_49 = arith.constant 141 : index
    %106 = vector.load %arg4[%c1_47, %c0_48, %c141_49] : memref<2x2x512xf32, #tpu.memory_space<vmem>>, vector<1x2x256xf32>
    %107 = vector.shape_cast %106 : vector<1x2x256xf32> to vector<2x256xf32>
    %108 = vector.broadcast %105 : f32 to vector<2x256xf32>
    %109 = arith.mulf %108, %107 : vector<2x256xf32>
    %110 = arith.addf %98, %109 : vector<2x256xf32>
    %c35 = arith.constant 35 : index
    %111 = memref.load %arg1[%c35] : memref<98xf32, #tpu.memory_space<smem>>
    %c0_50 = arith.constant 0 : index
    %c0_51 = arith.constant 0 : index
    %c157 = arith.constant 157 : index
    %112 = vector.load %arg4[%c0_50, %c0_51, %c157] : memref<2x2x512xf32, #tpu.memory_space<vmem>>, vector<1x2x256xf32>
    %113 = vector.shape_cast %112 : vector<1x2x256xf32> to vector<2x256xf32>
    %114 = vector.broadcast %111 : f32 to vector<2x256xf32>
    %115 = arith.mulf %114, %113 : vector<2x256xf32>
    %116 = arith.addf %104, %115 : vector<2x256xf32>
    %c84 = arith.constant 84 : index
    %117 = memref.load %arg1[%c84] : memref<98xf32, #tpu.memory_space<smem>>
    %c1_52 = arith.constant 1 : index
    %c0_53 = arith.constant 0 : index
    %c157_54 = arith.constant 157 : index
    %118 = vector.load %arg4[%c1_52, %c0_53, %c157_54] : memref<2x2x512xf32, #tpu.memory_space<vmem>>, vector<1x2x256xf32>
    %119 = vector.shape_cast %118 : vector<1x2x256xf32> to vector<2x256xf32>
    %120 = vector.broadcast %117 : f32 to vector<2x256xf32>
    %121 = arith.mulf %120, %119 : vector<2x256xf32>
    %122 = arith.addf %110, %121 : vector<2x256xf32>
    %c42 = arith.constant 42 : index
    %123 = memref.load %arg1[%c42] : memref<98xf32, #tpu.memory_space<smem>>
    %c0_55 = arith.constant 0 : index
    %c0_56 = arith.constant 0 : index
    %c173 = arith.constant 173 : index
    %124 = vector.load %arg4[%c0_55, %c0_56, %c173] : memref<2x2x512xf32, #tpu.memory_space<vmem>>, vector<1x2x256xf32>
    %125 = vector.shape_cast %124 : vector<1x2x256xf32> to vector<2x256xf32>
    %126 = vector.broadcast %123 : f32 to vector<2x256xf32>
    %127 = arith.mulf %126, %125 : vector<2x256xf32>
    %128 = arith.addf %116, %127 : vector<2x256xf32>
    %c91 = arith.constant 91 : index
    %129 = memref.load %arg1[%c91] : memref<98xf32, #tpu.memory_space<smem>>
    %c1_57 = arith.constant 1 : index
    %c0_58 = arith.constant 0 : index
    %c173_59 = arith.constant 173 : index
    %130 = vector.load %arg4[%c1_57, %c0_58, %c173_59] : memref<2x2x512xf32, #tpu.memory_space<vmem>>, vector<1x2x256xf32>
    %131 = vector.shape_cast %130 : vector<1x2x256xf32> to vector<2x256xf32>
    %132 = vector.broadcast %129 : f32 to vector<2x256xf32>
    %133 = arith.mulf %132, %131 : vector<2x256xf32>
    %134 = arith.addf %122, %133 : vector<2x256xf32>
    %135 = arith.addf %128, %134 : vector<2x256xf32>
    %cst_60 = arith.constant 0.000000e+00 : f32
    %136 = vector.shape_cast %48 : vector<1x256xi1> to vector<1x256xi1>
    %137 = vector.broadcast %136 : vector<1x256xi1> to vector<2x256xi1>
    %138 = vector.broadcast %cst_60 : f32 to vector<2x256xf32>
    %139 = arith.select %137, %135, %138 : vector<2x256xi1>, vector<2x256xf32>
    %140 = arith.addf %39, %139 : vector<2x256xf32>
    %c-2_i32 = arith.constant -2 : i32
    %141 = vector.broadcast %c-2_i32 : i32 to vector<1x256xi32>
    %142 = arith.addi %38, %141 : vector<1x256xi32>
    %c0_i32_61 = arith.constant 0 : i32
    %143 = vector.broadcast %c0_i32_61 : i32 to vector<1x256xi32>
    %144 = arith.cmpi sge, %142, %143 : vector<1x256xi32>
    %c-2_i32_62 = arith.constant -2 : i32
    %145 = vector.broadcast %c-2_i32_62 : i32 to vector<1x256xi32>
    %146 = arith.addi %38, %145 : vector<1x256xi32>
    %c15_i32_63 = arith.constant 15 : i32
    %147 = vector.broadcast %c15_i32_63 : i32 to vector<1x256xi32>
    %148 = arith.cmpi sle, %146, %147 : vector<1x256xi32>
    %149 = arith.andi %144, %148 : vector<1x256xi1>
    %cst_64 = arith.constant 0.000000e+00 : f32
    %150 = vector.broadcast %cst_64 : f32 to vector<2x256xf32>
    %cst_65 = arith.constant 0.000000e+00 : f32
    %151 = vector.broadcast %cst_65 : f32 to vector<2x256xf32>
    %c1_66 = arith.constant 1 : index
    %152 = memref.load %arg1[%c1_66] : memref<98xf32, #tpu.memory_space<smem>>
    %c0_67 = arith.constant 0 : index
    %c0_68 = arith.constant 0 : index
    %c78 = arith.constant 78 : index
    %153 = vector.load %arg4[%c0_67, %c0_68, %c78] : memref<2x2x512xf32, #tpu.memory_space<vmem>>, vector<1x2x256xf32>
    %154 = vector.shape_cast %153 : vector<1x2x256xf32> to vector<2x256xf32>
    %155 = vector.broadcast %152 : f32 to vector<2x256xf32>
    %156 = arith.mulf %155, %154 : vector<2x256xf32>
    %157 = arith.addf %150, %156 : vector<2x256xf32>
    %c50 = arith.constant 50 : index
    %158 = memref.load %arg1[%c50] : memref<98xf32, #tpu.memory_space<smem>>
    %c1_69 = arith.constant 1 : index
    %c0_70 = arith.constant 0 : index
    %c78_71 = arith.constant 78 : index
    %159 = vector.load %arg4[%c1_69, %c0_70, %c78_71] : memref<2x2x512xf32, #tpu.memory_space<vmem>>, vector<1x2x256xf32>
    %160 = vector.shape_cast %159 : vector<1x2x256xf32> to vector<2x256xf32>
    %161 = vector.broadcast %158 : f32 to vector<2x256xf32>
    %162 = arith.mulf %161, %160 : vector<2x256xf32>
    %163 = arith.addf %151, %162 : vector<2x256xf32>
    %c8 = arith.constant 8 : index
    %164 = memref.load %arg1[%c8] : memref<98xf32, #tpu.memory_space<smem>>
    %c0_72 = arith.constant 0 : index
    %c0_73 = arith.constant 0 : index
    %c94 = arith.constant 94 : index
    %165 = vector.load %arg4[%c0_72, %c0_73, %c94] : memref<2x2x512xf32, #tpu.memory_space<vmem>>, vector<1x2x256xf32>
    %166 = vector.shape_cast %165 : vector<1x2x256xf32> to vector<2x256xf32>
    %167 = vector.broadcast %164 : f32 to vector<2x256xf32>
    %168 = arith.mulf %167, %166 : vector<2x256xf32>
    %169 = arith.addf %157, %168 : vector<2x256xf32>
    %c57 = arith.constant 57 : index
    %170 = memref.load %arg1[%c57] : memref<98xf32, #tpu.memory_space<smem>>
    %c1_74 = arith.constant 1 : index
    %c0_75 = arith.constant 0 : index
    %c94_76 = arith.constant 94 : index
    %171 = vector.load %arg4[%c1_74, %c0_75, %c94_76] : memref<2x2x512xf32, #tpu.memory_space<vmem>>, vector<1x2x256xf32>
    %172 = vector.shape_cast %171 : vector<1x2x256xf32> to vector<2x256xf32>
    %173 = vector.broadcast %170 : f32 to vector<2x256xf32>
    %174 = arith.mulf %173, %172 : vector<2x256xf32>
    %175 = arith.addf %163, %174 : vector<2x256xf32>
    %c15 = arith.constant 15 : index
    %176 = memref.load %arg1[%c15] : memref<98xf32, #tpu.memory_space<smem>>
    %c0_77 = arith.constant 0 : index
    %c0_78 = arith.constant 0 : index
    %c110 = arith.constant 110 : index
    %177 = vector.load %arg4[%c0_77, %c0_78, %c110] : memref<2x2x512xf32, #tpu.memory_space<vmem>>, vector<1x2x256xf32>
    %178 = vector.shape_cast %177 : vector<1x2x256xf32> to vector<2x256xf32>
    %179 = vector.broadcast %176 : f32 to vector<2x256xf32>
    %180 = arith.mulf %179, %178 : vector<2x256xf32>
    %181 = arith.addf %169, %180 : vector<2x256xf32>
    %c64 = arith.constant 64 : index
    %182 = memref.load %arg1[%c64] : memref<98xf32, #tpu.memory_space<smem>>
    %c1_79 = arith.constant 1 : index
    %c0_80 = arith.constant 0 : index
    %c110_81 = arith.constant 110 : index
    %183 = vector.load %arg4[%c1_79, %c0_80, %c110_81] : memref<2x2x512xf32, #tpu.memory_space<vmem>>, vector<1x2x256xf32>
    %184 = vector.shape_cast %183 : vector<1x2x256xf32> to vector<2x256xf32>
    %185 = vector.broadcast %182 : f32 to vector<2x256xf32>
    %186 = arith.mulf %185, %184 : vector<2x256xf32>
    %187 = arith.addf %175, %186 : vector<2x256xf32>
    %c22 = arith.constant 22 : index
    %188 = memref.load %arg1[%c22] : memref<98xf32, #tpu.memory_space<smem>>
    %c0_82 = arith.constant 0 : index
    %c0_83 = arith.constant 0 : index
    %c126 = arith.constant 126 : index
    %189 = vector.load %arg4[%c0_82, %c0_83, %c126] : memref<2x2x512xf32, #tpu.memory_space<vmem>>, vector<1x2x256xf32>
    %190 = vector.shape_cast %189 : vector<1x2x256xf32> to vector<2x256xf32>
    %191 = vector.broadcast %188 : f32 to vector<2x256xf32>
    %192 = arith.mulf %191, %190 : vector<2x256xf32>
    %193 = arith.addf %181, %192 : vector<2x256xf32>
    %c71 = arith.constant 71 : index
    %194 = memref.load %arg1[%c71] : memref<98xf32, #tpu.memory_space<smem>>
    %c1_84 = arith.constant 1 : index
    %c0_85 = arith.constant 0 : index
    %c126_86 = arith.constant 126 : index
    %195 = vector.load %arg4[%c1_84, %c0_85, %c126_86] : memref<2x2x512xf32, #tpu.memory_space<vmem>>, vector<1x2x256xf32>
    %196 = vector.shape_cast %195 : vector<1x2x256xf32> to vector<2x256xf32>
    %197 = vector.broadcast %194 : f32 to vector<2x256xf32>
    %198 = arith.mulf %197, %196 : vector<2x256xf32>
    %199 = arith.addf %187, %198 : vector<2x256xf32>
    %c29 = arith.constant 29 : index
    %200 = memref.load %arg1[%c29] : memref<98xf32, #tpu.memory_space<smem>>
    %c0_87 = arith.constant 0 : index
    %c0_88 = arith.constant 0 : index
    %c142 = arith.constant 142 : index
    %201 = vector.load %arg4[%c0_87, %c0_88, %c142] : memref<2x2x512xf32, #tpu.memory_space<vmem>>, vector<1x2x256xf32>
    %202 = vector.shape_cast %201 : vector<1x2x256xf32> to vector<2x256xf32>
    %203 = vector.broadcast %200 : f32 to vector<2x256xf32>
    %204 = arith.mulf %203, %202 : vector<2x256xf32>
    %205 = arith.addf %193, %204 : vector<2x256xf32>
    %c78_89 = arith.constant 78 : index
    %206 = memref.load %arg1[%c78_89] : memref<98xf32, #tpu.memory_space<smem>>
    %c1_90 = arith.constant 1 : index
    %c0_91 = arith.constant 0 : index
    %c142_92 = arith.constant 142 : index
    %207 = vector.load %arg4[%c1_90, %c0_91, %c142_92] : memref<2x2x512xf32, #tpu.memory_space<vmem>>, vector<1x2x256xf32>
    %208 = vector.shape_cast %207 : vector<1x2x256xf32> to vector<2x256xf32>
    %209 = vector.broadcast %206 : f32 to vector<2x256xf32>
    %210 = arith.mulf %209, %208 : vector<2x256xf32>
    %211 = arith.addf %199, %210 : vector<2x256xf32>
    %c36 = arith.constant 36 : index
    %212 = memref.load %arg1[%c36] : memref<98xf32, #tpu.memory_space<smem>>
    %c0_93 = arith.constant 0 : index
    %c0_94 = arith.constant 0 : index
    %c158 = arith.constant 158 : index
    %213 = vector.load %arg4[%c0_93, %c0_94, %c158] : memref<2x2x512xf32, #tpu.memory_space<vmem>>, vector<1x2x256xf32>
    %214 = vector.shape_cast %213 : vector<1x2x256xf32> to vector<2x256xf32>
    %215 = vector.broadcast %212 : f32 to vector<2x256xf32>
    %216 = arith.mulf %215, %214 : vector<2x256xf32>
    %217 = arith.addf %205, %216 : vector<2x256xf32>
    %c85 = arith.constant 85 : index
    %218 = memref.load %arg1[%c85] : memref<98xf32, #tpu.memory_space<smem>>
    %c1_95 = arith.constant 1 : index
    %c0_96 = arith.constant 0 : index
    %c158_97 = arith.constant 158 : index
    %219 = vector.load %arg4[%c1_95, %c0_96, %c158_97] : memref<2x2x512xf32, #tpu.memory_space<vmem>>, vector<1x2x256xf32>
    %220 = vector.shape_cast %219 : vector<1x2x256xf32> to vector<2x256xf32>
    %221 = vector.broadcast %218 : f32 to vector<2x256xf32>
    %222 = arith.mulf %221, %220 : vector<2x256xf32>
    %223 = arith.addf %211, %222 : vector<2x256xf32>
    %c43 = arith.constant 43 : index
    %224 = memref.load %arg1[%c43] : memref<98xf32, #tpu.memory_space<smem>>
    %c0_98 = arith.constant 0 : index
    %c0_99 = arith.constant 0 : index
    %c174 = arith.constant 174 : index
    %225 = vector.load %arg4[%c0_98, %c0_99, %c174] : memref<2x2x512xf32, #tpu.memory_space<vmem>>, vector<1x2x256xf32>
    %226 = vector.shape_cast %225 : vector<1x2x256xf32> to vector<2x256xf32>
    %227 = vector.broadcast %224 : f32 to vector<2x256xf32>
    %228 = arith.mulf %227, %226 : vector<2x256xf32>
    %229 = arith.addf %217, %228 : vector<2x256xf32>
    %c92 = arith.constant 92 : index
    %230 = memref.load %arg1[%c92] : memref<98xf32, #tpu.memory_space<smem>>
    %c1_100 = arith.constant 1 : index
    %c0_101 = arith.constant 0 : index
    %c174_102 = arith.constant 174 : index
    %231 = vector.load %arg4[%c1_100, %c0_101, %c174_102] : memref<2x2x512xf32, #tpu.memory_space<vmem>>, vector<1x2x256xf32>
    %232 = vector.shape_cast %231 : vector<1x2x256xf32> to vector<2x256xf32>
    %233 = vector.broadcast %230 : f32 to vector<2x256xf32>
    %234 = arith.mulf %233, %232 : vector<2x256xf32>
    %235 = arith.addf %223, %234 : vector<2x256xf32>
    %236 = arith.addf %229, %235 : vector<2x256xf32>
    %cst_103 = arith.constant 0.000000e+00 : f32
    %237 = vector.shape_cast %149 : vector<1x256xi1> to vector<1x256xi1>
    %238 = vector.broadcast %237 : vector<1x256xi1> to vector<2x256xi1>
    %239 = vector.broadcast %cst_103 : f32 to vector<2x256xf32>
    %240 = arith.select %238, %236, %239 : vector<2x256xi1>, vector<2x256xf32>
    %241 = arith.addf %140, %240 : vector<2x256xf32>
    %c-1_i32 = arith.constant -1 : i32
    %242 = vector.broadcast %c-1_i32 : i32 to vector<1x256xi32>
    %243 = arith.addi %38, %242 : vector<1x256xi32>
    %c0_i32_104 = arith.constant 0 : i32
    %244 = vector.broadcast %c0_i32_104 : i32 to vector<1x256xi32>
    %245 = arith.cmpi sge, %243, %244 : vector<1x256xi32>
    %c-1_i32_105 = arith.constant -1 : i32
    %246 = vector.broadcast %c-1_i32_105 : i32 to vector<1x256xi32>
    %247 = arith.addi %38, %246 : vector<1x256xi32>
    %c15_i32_106 = arith.constant 15 : i32
    %248 = vector.broadcast %c15_i32_106 : i32 to vector<1x256xi32>
    %249 = arith.cmpi sle, %247, %248 : vector<1x256xi32>
    %250 = arith.andi %245, %249 : vector<1x256xi1>
    %cst_107 = arith.constant 0.000000e+00 : f32
    %251 = vector.broadcast %cst_107 : f32 to vector<2x256xf32>
    %cst_108 = arith.constant 0.000000e+00 : f32
    %252 = vector.broadcast %cst_108 : f32 to vector<2x256xf32>
    %c2 = arith.constant 2 : index
    %253 = memref.load %arg1[%c2] : memref<98xf32, #tpu.memory_space<smem>>
    %c0_109 = arith.constant 0 : index
    %c0_110 = arith.constant 0 : index
    %c79 = arith.constant 79 : index
    %254 = vector.load %arg4[%c0_109, %c0_110, %c79] : memref<2x2x512xf32, #tpu.memory_space<vmem>>, vector<1x2x256xf32>
    %255 = vector.shape_cast %254 : vector<1x2x256xf32> to vector<2x256xf32>
    %256 = vector.broadcast %253 : f32 to vector<2x256xf32>
    %257 = arith.mulf %256, %255 : vector<2x256xf32>
    %258 = arith.addf %251, %257 : vector<2x256xf32>
    %c51 = arith.constant 51 : index
    %259 = memref.load %arg1[%c51] : memref<98xf32, #tpu.memory_space<smem>>
    %c1_111 = arith.constant 1 : index
    %c0_112 = arith.constant 0 : index
    %c79_113 = arith.constant 79 : index
    %260 = vector.load %arg4[%c1_111, %c0_112, %c79_113] : memref<2x2x512xf32, #tpu.memory_space<vmem>>, vector<1x2x256xf32>
    %261 = vector.shape_cast %260 : vector<1x2x256xf32> to vector<2x256xf32>
    %262 = vector.broadcast %259 : f32 to vector<2x256xf32>
    %263 = arith.mulf %262, %261 : vector<2x256xf32>
    %264 = arith.addf %252, %263 : vector<2x256xf32>
    %c9 = arith.constant 9 : index
    %265 = memref.load %arg1[%c9] : memref<98xf32, #tpu.memory_space<smem>>
    %c0_114 = arith.constant 0 : index
    %c0_115 = arith.constant 0 : index
    %c95 = arith.constant 95 : index
    %266 = vector.load %arg4[%c0_114, %c0_115, %c95] : memref<2x2x512xf32, #tpu.memory_space<vmem>>, vector<1x2x256xf32>
    %267 = vector.shape_cast %266 : vector<1x2x256xf32> to vector<2x256xf32>
    %268 = vector.broadcast %265 : f32 to vector<2x256xf32>
    %269 = arith.mulf %268, %267 : vector<2x256xf32>
    %270 = arith.addf %258, %269 : vector<2x256xf32>
    %c58 = arith.constant 58 : index
    %271 = memref.load %arg1[%c58] : memref<98xf32, #tpu.memory_space<smem>>
    %c1_116 = arith.constant 1 : index
    %c0_117 = arith.constant 0 : index
    %c95_118 = arith.constant 95 : index
    %272 = vector.load %arg4[%c1_116, %c0_117, %c95_118] : memref<2x2x512xf32, #tpu.memory_space<vmem>>, vector<1x2x256xf32>
    %273 = vector.shape_cast %272 : vector<1x2x256xf32> to vector<2x256xf32>
    %274 = vector.broadcast %271 : f32 to vector<2x256xf32>
    %275 = arith.mulf %274, %273 : vector<2x256xf32>
    %276 = arith.addf %264, %275 : vector<2x256xf32>
    %c16 = arith.constant 16 : index
    %277 = memref.load %arg1[%c16] : memref<98xf32, #tpu.memory_space<smem>>
    %c0_119 = arith.constant 0 : index
    %c0_120 = arith.constant 0 : index
    %c111 = arith.constant 111 : index
    %278 = vector.load %arg4[%c0_119, %c0_120, %c111] : memref<2x2x512xf32, #tpu.memory_space<vmem>>, vector<1x2x256xf32>
    %279 = vector.shape_cast %278 : vector<1x2x256xf32> to vector<2x256xf32>
    %280 = vector.broadcast %277 : f32 to vector<2x256xf32>
    %281 = arith.mulf %280, %279 : vector<2x256xf32>
    %282 = arith.addf %270, %281 : vector<2x256xf32>
    %c65 = arith.constant 65 : index
    %283 = memref.load %arg1[%c65] : memref<98xf32, #tpu.memory_space<smem>>
    %c1_121 = arith.constant 1 : index
    %c0_122 = arith.constant 0 : index
    %c111_123 = arith.constant 111 : index
    %284 = vector.load %arg4[%c1_121, %c0_122, %c111_123] : memref<2x2x512xf32, #tpu.memory_space<vmem>>, vector<1x2x256xf32>
    %285 = vector.shape_cast %284 : vector<1x2x256xf32> to vector<2x256xf32>
    %286 = vector.broadcast %283 : f32 to vector<2x256xf32>
    %287 = arith.mulf %286, %285 : vector<2x256xf32>
    %288 = arith.addf %276, %287 : vector<2x256xf32>
    %c23 = arith.constant 23 : index
    %289 = memref.load %arg1[%c23] : memref<98xf32, #tpu.memory_space<smem>>
    %c0_124 = arith.constant 0 : index
    %c0_125 = arith.constant 0 : index
    %c127 = arith.constant 127 : index
    %290 = vector.load %arg4[%c0_124, %c0_125, %c127] : memref<2x2x512xf32, #tpu.memory_space<vmem>>, vector<1x2x256xf32>
    %291 = vector.shape_cast %290 : vector<1x2x256xf32> to vector<2x256xf32>
    %292 = vector.broadcast %289 : f32 to vector<2x256xf32>
    %293 = arith.mulf %292, %291 : vector<2x256xf32>
    %294 = arith.addf %282, %293 : vector<2x256xf32>
    %c72 = arith.constant 72 : index
    %295 = memref.load %arg1[%c72] : memref<98xf32, #tpu.memory_space<smem>>
    %c1_126 = arith.constant 1 : index
    %c0_127 = arith.constant 0 : index
    %c127_128 = arith.constant 127 : index
    %296 = vector.load %arg4[%c1_126, %c0_127, %c127_128] : memref<2x2x512xf32, #tpu.memory_space<vmem>>, vector<1x2x256xf32>
    %297 = vector.shape_cast %296 : vector<1x2x256xf32> to vector<2x256xf32>
    %298 = vector.broadcast %295 : f32 to vector<2x256xf32>
    %299 = arith.mulf %298, %297 : vector<2x256xf32>
    %300 = arith.addf %288, %299 : vector<2x256xf32>
    %c30 = arith.constant 30 : index
    %301 = memref.load %arg1[%c30] : memref<98xf32, #tpu.memory_space<smem>>
    %c0_129 = arith.constant 0 : index
    %c0_130 = arith.constant 0 : index
    %c143 = arith.constant 143 : index
    %302 = vector.load %arg4[%c0_129, %c0_130, %c143] : memref<2x2x512xf32, #tpu.memory_space<vmem>>, vector<1x2x256xf32>
    %303 = vector.shape_cast %302 : vector<1x2x256xf32> to vector<2x256xf32>
    %304 = vector.broadcast %301 : f32 to vector<2x256xf32>
    %305 = arith.mulf %304, %303 : vector<2x256xf32>
    %306 = arith.addf %294, %305 : vector<2x256xf32>
    %c79_131 = arith.constant 79 : index
    %307 = memref.load %arg1[%c79_131] : memref<98xf32, #tpu.memory_space<smem>>
    %c1_132 = arith.constant 1 : index
    %c0_133 = arith.constant 0 : index
    %c143_134 = arith.constant 143 : index
    %308 = vector.load %arg4[%c1_132, %c0_133, %c143_134] : memref<2x2x512xf32, #tpu.memory_space<vmem>>, vector<1x2x256xf32>
    %309 = vector.shape_cast %308 : vector<1x2x256xf32> to vector<2x256xf32>
    %310 = vector.broadcast %307 : f32 to vector<2x256xf32>
    %311 = arith.mulf %310, %309 : vector<2x256xf32>
    %312 = arith.addf %300, %311 : vector<2x256xf32>
    %c37 = arith.constant 37 : index
    %313 = memref.load %arg1[%c37] : memref<98xf32, #tpu.memory_space<smem>>
    %c0_135 = arith.constant 0 : index
    %c0_136 = arith.constant 0 : index
    %c159 = arith.constant 159 : index
    %314 = vector.load %arg4[%c0_135, %c0_136, %c159] : memref<2x2x512xf32, #tpu.memory_space<vmem>>, vector<1x2x256xf32>
    %315 = vector.shape_cast %314 : vector<1x2x256xf32> to vector<2x256xf32>
    %316 = vector.broadcast %313 : f32 to vector<2x256xf32>
    %317 = arith.mulf %316, %315 : vector<2x256xf32>
    %318 = arith.addf %306, %317 : vector<2x256xf32>
    %c86 = arith.constant 86 : index
    %319 = memref.load %arg1[%c86] : memref<98xf32, #tpu.memory_space<smem>>
    %c1_137 = arith.constant 1 : index
    %c0_138 = arith.constant 0 : index
    %c159_139 = arith.constant 159 : index
    %320 = vector.load %arg4[%c1_137, %c0_138, %c159_139] : memref<2x2x512xf32, #tpu.memory_space<vmem>>, vector<1x2x256xf32>
    %321 = vector.shape_cast %320 : vector<1x2x256xf32> to vector<2x256xf32>
    %322 = vector.broadcast %319 : f32 to vector<2x256xf32>
    %323 = arith.mulf %322, %321 : vector<2x256xf32>
    %324 = arith.addf %312, %323 : vector<2x256xf32>
    %c44 = arith.constant 44 : index
    %325 = memref.load %arg1[%c44] : memref<98xf32, #tpu.memory_space<smem>>
    %c0_140 = arith.constant 0 : index
    %c0_141 = arith.constant 0 : index
    %c175 = arith.constant 175 : index
    %326 = vector.load %arg4[%c0_140, %c0_141, %c175] : memref<2x2x512xf32, #tpu.memory_space<vmem>>, vector<1x2x256xf32>
    %327 = vector.shape_cast %326 : vector<1x2x256xf32> to vector<2x256xf32>
    %328 = vector.broadcast %325 : f32 to vector<2x256xf32>
    %329 = arith.mulf %328, %327 : vector<2x256xf32>
    %330 = arith.addf %318, %329 : vector<2x256xf32>
    %c93_142 = arith.constant 93 : index
    %331 = memref.load %arg1[%c93_142] : memref<98xf32, #tpu.memory_space<smem>>
    %c1_143 = arith.constant 1 : index
    %c0_144 = arith.constant 0 : index
    %c175_145 = arith.constant 175 : index
    %332 = vector.load %arg4[%c1_143, %c0_144, %c175_145] : memref<2x2x512xf32, #tpu.memory_space<vmem>>, vector<1x2x256xf32>
    %333 = vector.shape_cast %332 : vector<1x2x256xf32> to vector<2x256xf32>
    %334 = vector.broadcast %331 : f32 to vector<2x256xf32>
    %335 = arith.mulf %334, %333 : vector<2x256xf32>
    %336 = arith.addf %324, %335 : vector<2x256xf32>
    %337 = arith.addf %330, %336 : vector<2x256xf32>
    %cst_146 = arith.constant 0.000000e+00 : f32
    %338 = vector.shape_cast %250 : vector<1x256xi1> to vector<1x256xi1>
    %339 = vector.broadcast %338 : vector<1x256xi1> to vector<2x256xi1>
    %340 = vector.broadcast %cst_146 : f32 to vector<2x256xf32>
    %341 = arith.select %339, %337, %340 : vector<2x256xi1>, vector<2x256xf32>
    %342 = arith.addf %241, %341 : vector<2x256xf32>
    %c0_i32_147 = arith.constant 0 : i32
    %343 = vector.broadcast %c0_i32_147 : i32 to vector<1x256xi32>
    %344 = arith.addi %38, %343 : vector<1x256xi32>
    %c0_i32_148 = arith.constant 0 : i32
    %345 = vector.broadcast %c0_i32_148 : i32 to vector<1x256xi32>
    %346 = arith.cmpi sge, %344, %345 : vector<1x256xi32>
    %c0_i32_149 = arith.constant 0 : i32
    %347 = vector.broadcast %c0_i32_149 : i32 to vector<1x256xi32>
    %348 = arith.addi %38, %347 : vector<1x256xi32>
    %c15_i32_150 = arith.constant 15 : i32
    %349 = vector.broadcast %c15_i32_150 : i32 to vector<1x256xi32>
    %350 = arith.cmpi sle, %348, %349 : vector<1x256xi32>
    %351 = arith.andi %346, %350 : vector<1x256xi1>
    %cst_151 = arith.constant 0.000000e+00 : f32
    %352 = vector.broadcast %cst_151 : f32 to vector<2x256xf32>
    %cst_152 = arith.constant 0.000000e+00 : f32
    %353 = vector.broadcast %cst_152 : f32 to vector<2x256xf32>
    %c3 = arith.constant 3 : index
    %354 = memref.load %arg1[%c3] : memref<98xf32, #tpu.memory_space<smem>>
    %c0_153 = arith.constant 0 : index
    %c0_154 = arith.constant 0 : index
    %c80 = arith.constant 80 : index
    %355 = vector.load %arg4[%c0_153, %c0_154, %c80] : memref<2x2x512xf32, #tpu.memory_space<vmem>>, vector<1x2x256xf32>
    %356 = vector.shape_cast %355 : vector<1x2x256xf32> to vector<2x256xf32>
    %357 = vector.broadcast %354 : f32 to vector<2x256xf32>
    %358 = arith.mulf %357, %356 : vector<2x256xf32>
    %359 = arith.addf %352, %358 : vector<2x256xf32>
    %c52 = arith.constant 52 : index
    %360 = memref.load %arg1[%c52] : memref<98xf32, #tpu.memory_space<smem>>
    %c1_155 = arith.constant 1 : index
    %c0_156 = arith.constant 0 : index
    %c80_157 = arith.constant 80 : index
    %361 = vector.load %arg4[%c1_155, %c0_156, %c80_157] : memref<2x2x512xf32, #tpu.memory_space<vmem>>, vector<1x2x256xf32>
    %362 = vector.shape_cast %361 : vector<1x2x256xf32> to vector<2x256xf32>
    %363 = vector.broadcast %360 : f32 to vector<2x256xf32>
    %364 = arith.mulf %363, %362 : vector<2x256xf32>
    %365 = arith.addf %353, %364 : vector<2x256xf32>
    %c10 = arith.constant 10 : index
    %366 = memref.load %arg1[%c10] : memref<98xf32, #tpu.memory_space<smem>>
    %c0_158 = arith.constant 0 : index
    %c0_159 = arith.constant 0 : index
    %c96 = arith.constant 96 : index
    %367 = vector.load %arg4[%c0_158, %c0_159, %c96] : memref<2x2x512xf32, #tpu.memory_space<vmem>>, vector<1x2x256xf32>
    %368 = vector.shape_cast %367 : vector<1x2x256xf32> to vector<2x256xf32>
    %369 = vector.broadcast %366 : f32 to vector<2x256xf32>
    %370 = arith.mulf %369, %368 : vector<2x256xf32>
    %371 = arith.addf %359, %370 : vector<2x256xf32>
    %c59 = arith.constant 59 : index
    %372 = memref.load %arg1[%c59] : memref<98xf32, #tpu.memory_space<smem>>
    %c1_160 = arith.constant 1 : index
    %c0_161 = arith.constant 0 : index
    %c96_162 = arith.constant 96 : index
    %373 = vector.load %arg4[%c1_160, %c0_161, %c96_162] : memref<2x2x512xf32, #tpu.memory_space<vmem>>, vector<1x2x256xf32>
    %374 = vector.shape_cast %373 : vector<1x2x256xf32> to vector<2x256xf32>
    %375 = vector.broadcast %372 : f32 to vector<2x256xf32>
    %376 = arith.mulf %375, %374 : vector<2x256xf32>
    %377 = arith.addf %365, %376 : vector<2x256xf32>
    %c17 = arith.constant 17 : index
    %378 = memref.load %arg1[%c17] : memref<98xf32, #tpu.memory_space<smem>>
    %c0_163 = arith.constant 0 : index
    %c0_164 = arith.constant 0 : index
    %c112 = arith.constant 112 : index
    %379 = vector.load %arg4[%c0_163, %c0_164, %c112] : memref<2x2x512xf32, #tpu.memory_space<vmem>>, vector<1x2x256xf32>
    %380 = vector.shape_cast %379 : vector<1x2x256xf32> to vector<2x256xf32>
    %381 = vector.broadcast %378 : f32 to vector<2x256xf32>
    %382 = arith.mulf %381, %380 : vector<2x256xf32>
    %383 = arith.addf %371, %382 : vector<2x256xf32>
    %c66 = arith.constant 66 : index
    %384 = memref.load %arg1[%c66] : memref<98xf32, #tpu.memory_space<smem>>
    %c1_165 = arith.constant 1 : index
    %c0_166 = arith.constant 0 : index
    %c112_167 = arith.constant 112 : index
    %385 = vector.load %arg4[%c1_165, %c0_166, %c112_167] : memref<2x2x512xf32, #tpu.memory_space<vmem>>, vector<1x2x256xf32>
    %386 = vector.shape_cast %385 : vector<1x2x256xf32> to vector<2x256xf32>
    %387 = vector.broadcast %384 : f32 to vector<2x256xf32>
    %388 = arith.mulf %387, %386 : vector<2x256xf32>
    %389 = arith.addf %377, %388 : vector<2x256xf32>
    %c24 = arith.constant 24 : index
    %390 = memref.load %arg1[%c24] : memref<98xf32, #tpu.memory_space<smem>>
    %c0_168 = arith.constant 0 : index
    %c0_169 = arith.constant 0 : index
    %c128_170 = arith.constant 128 : index
    %391 = vector.load %arg4[%c0_168, %c0_169, %c128_170] : memref<2x2x512xf32, #tpu.memory_space<vmem>>, vector<1x2x256xf32>
    %392 = vector.shape_cast %391 : vector<1x2x256xf32> to vector<2x256xf32>
    %393 = vector.broadcast %390 : f32 to vector<2x256xf32>
    %394 = arith.mulf %393, %392 : vector<2x256xf32>
    %395 = arith.addf %383, %394 : vector<2x256xf32>
    %c73 = arith.constant 73 : index
    %396 = memref.load %arg1[%c73] : memref<98xf32, #tpu.memory_space<smem>>
    %c1_171 = arith.constant 1 : index
    %c0_172 = arith.constant 0 : index
    %c128_173 = arith.constant 128 : index
    %397 = vector.load %arg4[%c1_171, %c0_172, %c128_173] : memref<2x2x512xf32, #tpu.memory_space<vmem>>, vector<1x2x256xf32>
    %398 = vector.shape_cast %397 : vector<1x2x256xf32> to vector<2x256xf32>
    %399 = vector.broadcast %396 : f32 to vector<2x256xf32>
    %400 = arith.mulf %399, %398 : vector<2x256xf32>
    %401 = arith.addf %389, %400 : vector<2x256xf32>
    %c31 = arith.constant 31 : index
    %402 = memref.load %arg1[%c31] : memref<98xf32, #tpu.memory_space<smem>>
    %c0_174 = arith.constant 0 : index
    %c0_175 = arith.constant 0 : index
    %c144 = arith.constant 144 : index
    %403 = vector.load %arg4[%c0_174, %c0_175, %c144] : memref<2x2x512xf32, #tpu.memory_space<vmem>>, vector<1x2x256xf32>
    %404 = vector.shape_cast %403 : vector<1x2x256xf32> to vector<2x256xf32>
    %405 = vector.broadcast %402 : f32 to vector<2x256xf32>
    %406 = arith.mulf %405, %404 : vector<2x256xf32>
    %407 = arith.addf %395, %406 : vector<2x256xf32>
    %c80_176 = arith.constant 80 : index
    %408 = memref.load %arg1[%c80_176] : memref<98xf32, #tpu.memory_space<smem>>
    %c1_177 = arith.constant 1 : index
    %c0_178 = arith.constant 0 : index
    %c144_179 = arith.constant 144 : index
    %409 = vector.load %arg4[%c1_177, %c0_178, %c144_179] : memref<2x2x512xf32, #tpu.memory_space<vmem>>, vector<1x2x256xf32>
    %410 = vector.shape_cast %409 : vector<1x2x256xf32> to vector<2x256xf32>
    %411 = vector.broadcast %408 : f32 to vector<2x256xf32>
    %412 = arith.mulf %411, %410 : vector<2x256xf32>
    %413 = arith.addf %401, %412 : vector<2x256xf32>
    %c38 = arith.constant 38 : index
    %414 = memref.load %arg1[%c38] : memref<98xf32, #tpu.memory_space<smem>>
    %c0_180 = arith.constant 0 : index
    %c0_181 = arith.constant 0 : index
    %c160 = arith.constant 160 : index
    %415 = vector.load %arg4[%c0_180, %c0_181, %c160] : memref<2x2x512xf32, #tpu.memory_space<vmem>>, vector<1x2x256xf32>
    %416 = vector.shape_cast %415 : vector<1x2x256xf32> to vector<2x256xf32>
    %417 = vector.broadcast %414 : f32 to vector<2x256xf32>
    %418 = arith.mulf %417, %416 : vector<2x256xf32>
    %419 = arith.addf %407, %418 : vector<2x256xf32>
    %c87 = arith.constant 87 : index
    %420 = memref.load %arg1[%c87] : memref<98xf32, #tpu.memory_space<smem>>
    %c1_182 = arith.constant 1 : index
    %c0_183 = arith.constant 0 : index
    %c160_184 = arith.constant 160 : index
    %421 = vector.load %arg4[%c1_182, %c0_183, %c160_184] : memref<2x2x512xf32, #tpu.memory_space<vmem>>, vector<1x2x256xf32>
    %422 = vector.shape_cast %421 : vector<1x2x256xf32> to vector<2x256xf32>
    %423 = vector.broadcast %420 : f32 to vector<2x256xf32>
    %424 = arith.mulf %423, %422 : vector<2x256xf32>
    %425 = arith.addf %413, %424 : vector<2x256xf32>
    %c45 = arith.constant 45 : index
    %426 = memref.load %arg1[%c45] : memref<98xf32, #tpu.memory_space<smem>>
    %c0_185 = arith.constant 0 : index
    %c0_186 = arith.constant 0 : index
    %c176 = arith.constant 176 : index
    %427 = vector.load %arg4[%c0_185, %c0_186, %c176] : memref<2x2x512xf32, #tpu.memory_space<vmem>>, vector<1x2x256xf32>
    %428 = vector.shape_cast %427 : vector<1x2x256xf32> to vector<2x256xf32>
    %429 = vector.broadcast %426 : f32 to vector<2x256xf32>
    %430 = arith.mulf %429, %428 : vector<2x256xf32>
    %431 = arith.addf %419, %430 : vector<2x256xf32>
    %c94_187 = arith.constant 94 : index
    %432 = memref.load %arg1[%c94_187] : memref<98xf32, #tpu.memory_space<smem>>
    %c1_188 = arith.constant 1 : index
    %c0_189 = arith.constant 0 : index
    %c176_190 = arith.constant 176 : index
    %433 = vector.load %arg4[%c1_188, %c0_189, %c176_190] : memref<2x2x512xf32, #tpu.memory_space<vmem>>, vector<1x2x256xf32>
    %434 = vector.shape_cast %433 : vector<1x2x256xf32> to vector<2x256xf32>
    %435 = vector.broadcast %432 : f32 to vector<2x256xf32>
    %436 = arith.mulf %435, %434 : vector<2x256xf32>
    %437 = arith.addf %425, %436 : vector<2x256xf32>
    %438 = arith.addf %431, %437 : vector<2x256xf32>
    %cst_191 = arith.constant 0.000000e+00 : f32
    %439 = vector.shape_cast %351 : vector<1x256xi1> to vector<1x256xi1>
    %440 = vector.broadcast %439 : vector<1x256xi1> to vector<2x256xi1>
    %441 = vector.broadcast %cst_191 : f32 to vector<2x256xf32>
    %442 = arith.select %440, %438, %441 : vector<2x256xi1>, vector<2x256xf32>
    %443 = arith.addf %342, %442 : vector<2x256xf32>
    %c1_i32_192 = arith.constant 1 : i32
    %444 = vector.broadcast %c1_i32_192 : i32 to vector<1x256xi32>
    %445 = arith.addi %38, %444 : vector<1x256xi32>
    %c0_i32_193 = arith.constant 0 : i32
    %446 = vector.broadcast %c0_i32_193 : i32 to vector<1x256xi32>
    %447 = arith.cmpi sge, %445, %446 : vector<1x256xi32>
    %c1_i32_194 = arith.constant 1 : i32
    %448 = vector.broadcast %c1_i32_194 : i32 to vector<1x256xi32>
    %449 = arith.addi %38, %448 : vector<1x256xi32>
    %c15_i32_195 = arith.constant 15 : i32
    %450 = vector.broadcast %c15_i32_195 : i32 to vector<1x256xi32>
    %451 = arith.cmpi sle, %449, %450 : vector<1x256xi32>
    %452 = arith.andi %447, %451 : vector<1x256xi1>
    %cst_196 = arith.constant 0.000000e+00 : f32
    %453 = vector.broadcast %cst_196 : f32 to vector<2x256xf32>
    %cst_197 = arith.constant 0.000000e+00 : f32
    %454 = vector.broadcast %cst_197 : f32 to vector<2x256xf32>
    %c4 = arith.constant 4 : index
    %455 = memref.load %arg1[%c4] : memref<98xf32, #tpu.memory_space<smem>>
    %c0_198 = arith.constant 0 : index
    %c0_199 = arith.constant 0 : index
    %c81 = arith.constant 81 : index
    %456 = vector.load %arg4[%c0_198, %c0_199, %c81] : memref<2x2x512xf32, #tpu.memory_space<vmem>>, vector<1x2x256xf32>
    %457 = vector.shape_cast %456 : vector<1x2x256xf32> to vector<2x256xf32>
    %458 = vector.broadcast %455 : f32 to vector<2x256xf32>
    %459 = arith.mulf %458, %457 : vector<2x256xf32>
    %460 = arith.addf %453, %459 : vector<2x256xf32>
    %c53 = arith.constant 53 : index
    %461 = memref.load %arg1[%c53] : memref<98xf32, #tpu.memory_space<smem>>
    %c1_200 = arith.constant 1 : index
    %c0_201 = arith.constant 0 : index
    %c81_202 = arith.constant 81 : index
    %462 = vector.load %arg4[%c1_200, %c0_201, %c81_202] : memref<2x2x512xf32, #tpu.memory_space<vmem>>, vector<1x2x256xf32>
    %463 = vector.shape_cast %462 : vector<1x2x256xf32> to vector<2x256xf32>
    %464 = vector.broadcast %461 : f32 to vector<2x256xf32>
    %465 = arith.mulf %464, %463 : vector<2x256xf32>
    %466 = arith.addf %454, %465 : vector<2x256xf32>
    %c11 = arith.constant 11 : index
    %467 = memref.load %arg1[%c11] : memref<98xf32, #tpu.memory_space<smem>>
    %c0_203 = arith.constant 0 : index
    %c0_204 = arith.constant 0 : index
    %c97 = arith.constant 97 : index
    %468 = vector.load %arg4[%c0_203, %c0_204, %c97] : memref<2x2x512xf32, #tpu.memory_space<vmem>>, vector<1x2x256xf32>
    %469 = vector.shape_cast %468 : vector<1x2x256xf32> to vector<2x256xf32>
    %470 = vector.broadcast %467 : f32 to vector<2x256xf32>
    %471 = arith.mulf %470, %469 : vector<2x256xf32>
    %472 = arith.addf %460, %471 : vector<2x256xf32>
    %c60 = arith.constant 60 : index
    %473 = memref.load %arg1[%c60] : memref<98xf32, #tpu.memory_space<smem>>
    %c1_205 = arith.constant 1 : index
    %c0_206 = arith.constant 0 : index
    %c97_207 = arith.constant 97 : index
    %474 = vector.load %arg4[%c1_205, %c0_206, %c97_207] : memref<2x2x512xf32, #tpu.memory_space<vmem>>, vector<1x2x256xf32>
    %475 = vector.shape_cast %474 : vector<1x2x256xf32> to vector<2x256xf32>
    %476 = vector.broadcast %473 : f32 to vector<2x256xf32>
    %477 = arith.mulf %476, %475 : vector<2x256xf32>
    %478 = arith.addf %466, %477 : vector<2x256xf32>
    %c18 = arith.constant 18 : index
    %479 = memref.load %arg1[%c18] : memref<98xf32, #tpu.memory_space<smem>>
    %c0_208 = arith.constant 0 : index
    %c0_209 = arith.constant 0 : index
    %c113 = arith.constant 113 : index
    %480 = vector.load %arg4[%c0_208, %c0_209, %c113] : memref<2x2x512xf32, #tpu.memory_space<vmem>>, vector<1x2x256xf32>
    %481 = vector.shape_cast %480 : vector<1x2x256xf32> to vector<2x256xf32>
    %482 = vector.broadcast %479 : f32 to vector<2x256xf32>
    %483 = arith.mulf %482, %481 : vector<2x256xf32>
    %484 = arith.addf %472, %483 : vector<2x256xf32>
    %c67 = arith.constant 67 : index
    %485 = memref.load %arg1[%c67] : memref<98xf32, #tpu.memory_space<smem>>
    %c1_210 = arith.constant 1 : index
    %c0_211 = arith.constant 0 : index
    %c113_212 = arith.constant 113 : index
    %486 = vector.load %arg4[%c1_210, %c0_211, %c113_212] : memref<2x2x512xf32, #tpu.memory_space<vmem>>, vector<1x2x256xf32>
    %487 = vector.shape_cast %486 : vector<1x2x256xf32> to vector<2x256xf32>
    %488 = vector.broadcast %485 : f32 to vector<2x256xf32>
    %489 = arith.mulf %488, %487 : vector<2x256xf32>
    %490 = arith.addf %478, %489 : vector<2x256xf32>
    %c25 = arith.constant 25 : index
    %491 = memref.load %arg1[%c25] : memref<98xf32, #tpu.memory_space<smem>>
    %c0_213 = arith.constant 0 : index
    %c0_214 = arith.constant 0 : index
    %c129 = arith.constant 129 : index
    %492 = vector.load %arg4[%c0_213, %c0_214, %c129] : memref<2x2x512xf32, #tpu.memory_space<vmem>>, vector<1x2x256xf32>
    %493 = vector.shape_cast %492 : vector<1x2x256xf32> to vector<2x256xf32>
    %494 = vector.broadcast %491 : f32 to vector<2x256xf32>
    %495 = arith.mulf %494, %493 : vector<2x256xf32>
    %496 = arith.addf %484, %495 : vector<2x256xf32>
    %c74 = arith.constant 74 : index
    %497 = memref.load %arg1[%c74] : memref<98xf32, #tpu.memory_space<smem>>
    %c1_215 = arith.constant 1 : index
    %c0_216 = arith.constant 0 : index
    %c129_217 = arith.constant 129 : index
    %498 = vector.load %arg4[%c1_215, %c0_216, %c129_217] : memref<2x2x512xf32, #tpu.memory_space<vmem>>, vector<1x2x256xf32>
    %499 = vector.shape_cast %498 : vector<1x2x256xf32> to vector<2x256xf32>
    %500 = vector.broadcast %497 : f32 to vector<2x256xf32>
    %501 = arith.mulf %500, %499 : vector<2x256xf32>
    %502 = arith.addf %490, %501 : vector<2x256xf32>
    %c32 = arith.constant 32 : index
    %503 = memref.load %arg1[%c32] : memref<98xf32, #tpu.memory_space<smem>>
    %c0_218 = arith.constant 0 : index
    %c0_219 = arith.constant 0 : index
    %c145 = arith.constant 145 : index
    %504 = vector.load %arg4[%c0_218, %c0_219, %c145] : memref<2x2x512xf32, #tpu.memory_space<vmem>>, vector<1x2x256xf32>
    %505 = vector.shape_cast %504 : vector<1x2x256xf32> to vector<2x256xf32>
    %506 = vector.broadcast %503 : f32 to vector<2x256xf32>
    %507 = arith.mulf %506, %505 : vector<2x256xf32>
    %508 = arith.addf %496, %507 : vector<2x256xf32>
    %c81_220 = arith.constant 81 : index
    %509 = memref.load %arg1[%c81_220] : memref<98xf32, #tpu.memory_space<smem>>
    %c1_221 = arith.constant 1 : index
    %c0_222 = arith.constant 0 : index
    %c145_223 = arith.constant 145 : index
    %510 = vector.load %arg4[%c1_221, %c0_222, %c145_223] : memref<2x2x512xf32, #tpu.memory_space<vmem>>, vector<1x2x256xf32>
    %511 = vector.shape_cast %510 : vector<1x2x256xf32> to vector<2x256xf32>
    %512 = vector.broadcast %509 : f32 to vector<2x256xf32>
    %513 = arith.mulf %512, %511 : vector<2x256xf32>
    %514 = arith.addf %502, %513 : vector<2x256xf32>
    %c39 = arith.constant 39 : index
    %515 = memref.load %arg1[%c39] : memref<98xf32, #tpu.memory_space<smem>>
    %c0_224 = arith.constant 0 : index
    %c0_225 = arith.constant 0 : index
    %c161 = arith.constant 161 : index
    %516 = vector.load %arg4[%c0_224, %c0_225, %c161] : memref<2x2x512xf32, #tpu.memory_space<vmem>>, vector<1x2x256xf32>
    %517 = vector.shape_cast %516 : vector<1x2x256xf32> to vector<2x256xf32>
    %518 = vector.broadcast %515 : f32 to vector<2x256xf32>
    %519 = arith.mulf %518, %517 : vector<2x256xf32>
    %520 = arith.addf %508, %519 : vector<2x256xf32>
    %c88 = arith.constant 88 : index
    %521 = memref.load %arg1[%c88] : memref<98xf32, #tpu.memory_space<smem>>
    %c1_226 = arith.constant 1 : index
    %c0_227 = arith.constant 0 : index
    %c161_228 = arith.constant 161 : index
    %522 = vector.load %arg4[%c1_226, %c0_227, %c161_228] : memref<2x2x512xf32, #tpu.memory_space<vmem>>, vector<1x2x256xf32>
    %523 = vector.shape_cast %522 : vector<1x2x256xf32> to vector<2x256xf32>
    %524 = vector.broadcast %521 : f32 to vector<2x256xf32>
    %525 = arith.mulf %524, %523 : vector<2x256xf32>
    %526 = arith.addf %514, %525 : vector<2x256xf32>
    %c46 = arith.constant 46 : index
    %527 = memref.load %arg1[%c46] : memref<98xf32, #tpu.memory_space<smem>>
    %c0_229 = arith.constant 0 : index
    %c0_230 = arith.constant 0 : index
    %c177 = arith.constant 177 : index
    %528 = vector.load %arg4[%c0_229, %c0_230, %c177] : memref<2x2x512xf32, #tpu.memory_space<vmem>>, vector<1x2x256xf32>
    %529 = vector.shape_cast %528 : vector<1x2x256xf32> to vector<2x256xf32>
    %530 = vector.broadcast %527 : f32 to vector<2x256xf32>
    %531 = arith.mulf %530, %529 : vector<2x256xf32>
    %532 = arith.addf %520, %531 : vector<2x256xf32>
    %c95_231 = arith.constant 95 : index
    %533 = memref.load %arg1[%c95_231] : memref<98xf32, #tpu.memory_space<smem>>
    %c1_232 = arith.constant 1 : index
    %c0_233 = arith.constant 0 : index
    %c177_234 = arith.constant 177 : index
    %534 = vector.load %arg4[%c1_232, %c0_233, %c177_234] : memref<2x2x512xf32, #tpu.memory_space<vmem>>, vector<1x2x256xf32>
    %535 = vector.shape_cast %534 : vector<1x2x256xf32> to vector<2x256xf32>
    %536 = vector.broadcast %533 : f32 to vector<2x256xf32>
    %537 = arith.mulf %536, %535 : vector<2x256xf32>
    %538 = arith.addf %526, %537 : vector<2x256xf32>
    %539 = arith.addf %532, %538 : vector<2x256xf32>
    %cst_235 = arith.constant 0.000000e+00 : f32
    %540 = vector.shape_cast %452 : vector<1x256xi1> to vector<1x256xi1>
    %541 = vector.broadcast %540 : vector<1x256xi1> to vector<2x256xi1>
    %542 = vector.broadcast %cst_235 : f32 to vector<2x256xf32>
    %543 = arith.select %541, %539, %542 : vector<2x256xi1>, vector<2x256xf32>
    %544 = arith.addf %443, %543 : vector<2x256xf32>
    %c2_i32 = arith.constant 2 : i32
    %545 = vector.broadcast %c2_i32 : i32 to vector<1x256xi32>
    %546 = arith.addi %38, %545 : vector<1x256xi32>
    %c0_i32_236 = arith.constant 0 : i32
    %547 = vector.broadcast %c0_i32_236 : i32 to vector<1x256xi32>
    %548 = arith.cmpi sge, %546, %547 : vector<1x256xi32>
    %c2_i32_237 = arith.constant 2 : i32
    %549 = vector.broadcast %c2_i32_237 : i32 to vector<1x256xi32>
    %550 = arith.addi %38, %549 : vector<1x256xi32>
    %c15_i32_238 = arith.constant 15 : i32
    %551 = vector.broadcast %c15_i32_238 : i32 to vector<1x256xi32>
    %552 = arith.cmpi sle, %550, %551 : vector<1x256xi32>
    %553 = arith.andi %548, %552 : vector<1x256xi1>
    %cst_239 = arith.constant 0.000000e+00 : f32
    %554 = vector.broadcast %cst_239 : f32 to vector<2x256xf32>
    %cst_240 = arith.constant 0.000000e+00 : f32
    %555 = vector.broadcast %cst_240 : f32 to vector<2x256xf32>
    %c5 = arith.constant 5 : index
    %556 = memref.load %arg1[%c5] : memref<98xf32, #tpu.memory_space<smem>>
    %c0_241 = arith.constant 0 : index
    %c0_242 = arith.constant 0 : index
    %c82 = arith.constant 82 : index
    %557 = vector.load %arg4[%c0_241, %c0_242, %c82] : memref<2x2x512xf32, #tpu.memory_space<vmem>>, vector<1x2x256xf32>
    %558 = vector.shape_cast %557 : vector<1x2x256xf32> to vector<2x256xf32>
    %559 = vector.broadcast %556 : f32 to vector<2x256xf32>
    %560 = arith.mulf %559, %558 : vector<2x256xf32>
    %561 = arith.addf %554, %560 : vector<2x256xf32>
    %c54 = arith.constant 54 : index
    %562 = memref.load %arg1[%c54] : memref<98xf32, #tpu.memory_space<smem>>
    %c1_243 = arith.constant 1 : index
    %c0_244 = arith.constant 0 : index
    %c82_245 = arith.constant 82 : index
    %563 = vector.load %arg4[%c1_243, %c0_244, %c82_245] : memref<2x2x512xf32, #tpu.memory_space<vmem>>, vector<1x2x256xf32>
    %564 = vector.shape_cast %563 : vector<1x2x256xf32> to vector<2x256xf32>
    %565 = vector.broadcast %562 : f32 to vector<2x256xf32>
    %566 = arith.mulf %565, %564 : vector<2x256xf32>
    %567 = arith.addf %555, %566 : vector<2x256xf32>
    %c12 = arith.constant 12 : index
    %568 = memref.load %arg1[%c12] : memref<98xf32, #tpu.memory_space<smem>>
    %c0_246 = arith.constant 0 : index
    %c0_247 = arith.constant 0 : index
    %c98 = arith.constant 98 : index
    %569 = vector.load %arg4[%c0_246, %c0_247, %c98] : memref<2x2x512xf32, #tpu.memory_space<vmem>>, vector<1x2x256xf32>
    %570 = vector.shape_cast %569 : vector<1x2x256xf32> to vector<2x256xf32>
    %571 = vector.broadcast %568 : f32 to vector<2x256xf32>
    %572 = arith.mulf %571, %570 : vector<2x256xf32>
    %573 = arith.addf %561, %572 : vector<2x256xf32>
    %c61 = arith.constant 61 : index
    %574 = memref.load %arg1[%c61] : memref<98xf32, #tpu.memory_space<smem>>
    %c1_248 = arith.constant 1 : index
    %c0_249 = arith.constant 0 : index
    %c98_250 = arith.constant 98 : index
    %575 = vector.load %arg4[%c1_248, %c0_249, %c98_250] : memref<2x2x512xf32, #tpu.memory_space<vmem>>, vector<1x2x256xf32>
    %576 = vector.shape_cast %575 : vector<1x2x256xf32> to vector<2x256xf32>
    %577 = vector.broadcast %574 : f32 to vector<2x256xf32>
    %578 = arith.mulf %577, %576 : vector<2x256xf32>
    %579 = arith.addf %567, %578 : vector<2x256xf32>
    %c19 = arith.constant 19 : index
    %580 = memref.load %arg1[%c19] : memref<98xf32, #tpu.memory_space<smem>>
    %c0_251 = arith.constant 0 : index
    %c0_252 = arith.constant 0 : index
    %c114 = arith.constant 114 : index
    %581 = vector.load %arg4[%c0_251, %c0_252, %c114] : memref<2x2x512xf32, #tpu.memory_space<vmem>>, vector<1x2x256xf32>
    %582 = vector.shape_cast %581 : vector<1x2x256xf32> to vector<2x256xf32>
    %583 = vector.broadcast %580 : f32 to vector<2x256xf32>
    %584 = arith.mulf %583, %582 : vector<2x256xf32>
    %585 = arith.addf %573, %584 : vector<2x256xf32>
    %c68 = arith.constant 68 : index
    %586 = memref.load %arg1[%c68] : memref<98xf32, #tpu.memory_space<smem>>
    %c1_253 = arith.constant 1 : index
    %c0_254 = arith.constant 0 : index
    %c114_255 = arith.constant 114 : index
    %587 = vector.load %arg4[%c1_253, %c0_254, %c114_255] : memref<2x2x512xf32, #tpu.memory_space<vmem>>, vector<1x2x256xf32>
    %588 = vector.shape_cast %587 : vector<1x2x256xf32> to vector<2x256xf32>
    %589 = vector.broadcast %586 : f32 to vector<2x256xf32>
    %590 = arith.mulf %589, %588 : vector<2x256xf32>
    %591 = arith.addf %579, %590 : vector<2x256xf32>
    %c26 = arith.constant 26 : index
    %592 = memref.load %arg1[%c26] : memref<98xf32, #tpu.memory_space<smem>>
    %c0_256 = arith.constant 0 : index
    %c0_257 = arith.constant 0 : index
    %c130 = arith.constant 130 : index
    %593 = vector.load %arg4[%c0_256, %c0_257, %c130] : memref<2x2x512xf32, #tpu.memory_space<vmem>>, vector<1x2x256xf32>
    %594 = vector.shape_cast %593 : vector<1x2x256xf32> to vector<2x256xf32>
    %595 = vector.broadcast %592 : f32 to vector<2x256xf32>
    %596 = arith.mulf %595, %594 : vector<2x256xf32>
    %597 = arith.addf %585, %596 : vector<2x256xf32>
    %c75 = arith.constant 75 : index
    %598 = memref.load %arg1[%c75] : memref<98xf32, #tpu.memory_space<smem>>
    %c1_258 = arith.constant 1 : index
    %c0_259 = arith.constant 0 : index
    %c130_260 = arith.constant 130 : index
    %599 = vector.load %arg4[%c1_258, %c0_259, %c130_260] : memref<2x2x512xf32, #tpu.memory_space<vmem>>, vector<1x2x256xf32>
    %600 = vector.shape_cast %599 : vector<1x2x256xf32> to vector<2x256xf32>
    %601 = vector.broadcast %598 : f32 to vector<2x256xf32>
    %602 = arith.mulf %601, %600 : vector<2x256xf32>
    %603 = arith.addf %591, %602 : vector<2x256xf32>
    %c33 = arith.constant 33 : index
    %604 = memref.load %arg1[%c33] : memref<98xf32, #tpu.memory_space<smem>>
    %c0_261 = arith.constant 0 : index
    %c0_262 = arith.constant 0 : index
    %c146 = arith.constant 146 : index
    %605 = vector.load %arg4[%c0_261, %c0_262, %c146] : memref<2x2x512xf32, #tpu.memory_space<vmem>>, vector<1x2x256xf32>
    %606 = vector.shape_cast %605 : vector<1x2x256xf32> to vector<2x256xf32>
    %607 = vector.broadcast %604 : f32 to vector<2x256xf32>
    %608 = arith.mulf %607, %606 : vector<2x256xf32>
    %609 = arith.addf %597, %608 : vector<2x256xf32>
    %c82_263 = arith.constant 82 : index
    %610 = memref.load %arg1[%c82_263] : memref<98xf32, #tpu.memory_space<smem>>
    %c1_264 = arith.constant 1 : index
    %c0_265 = arith.constant 0 : index
    %c146_266 = arith.constant 146 : index
    %611 = vector.load %arg4[%c1_264, %c0_265, %c146_266] : memref<2x2x512xf32, #tpu.memory_space<vmem>>, vector<1x2x256xf32>
    %612 = vector.shape_cast %611 : vector<1x2x256xf32> to vector<2x256xf32>
    %613 = vector.broadcast %610 : f32 to vector<2x256xf32>
    %614 = arith.mulf %613, %612 : vector<2x256xf32>
    %615 = arith.addf %603, %614 : vector<2x256xf32>
    %c40 = arith.constant 40 : index
    %616 = memref.load %arg1[%c40] : memref<98xf32, #tpu.memory_space<smem>>
    %c0_267 = arith.constant 0 : index
    %c0_268 = arith.constant 0 : index
    %c162 = arith.constant 162 : index
    %617 = vector.load %arg4[%c0_267, %c0_268, %c162] : memref<2x2x512xf32, #tpu.memory_space<vmem>>, vector<1x2x256xf32>
    %618 = vector.shape_cast %617 : vector<1x2x256xf32> to vector<2x256xf32>
    %619 = vector.broadcast %616 : f32 to vector<2x256xf32>
    %620 = arith.mulf %619, %618 : vector<2x256xf32>
    %621 = arith.addf %609, %620 : vector<2x256xf32>
    %c89 = arith.constant 89 : index
    %622 = memref.load %arg1[%c89] : memref<98xf32, #tpu.memory_space<smem>>
    %c1_269 = arith.constant 1 : index
    %c0_270 = arith.constant 0 : index
    %c162_271 = arith.constant 162 : index
    %623 = vector.load %arg4[%c1_269, %c0_270, %c162_271] : memref<2x2x512xf32, #tpu.memory_space<vmem>>, vector<1x2x256xf32>
    %624 = vector.shape_cast %623 : vector<1x2x256xf32> to vector<2x256xf32>
    %625 = vector.broadcast %622 : f32 to vector<2x256xf32>
    %626 = arith.mulf %625, %624 : vector<2x256xf32>
    %627 = arith.addf %615, %626 : vector<2x256xf32>
    %c47 = arith.constant 47 : index
    %628 = memref.load %arg1[%c47] : memref<98xf32, #tpu.memory_space<smem>>
    %c0_272 = arith.constant 0 : index
    %c0_273 = arith.constant 0 : index
    %c178 = arith.constant 178 : index
    %629 = vector.load %arg4[%c0_272, %c0_273, %c178] : memref<2x2x512xf32, #tpu.memory_space<vmem>>, vector<1x2x256xf32>
    %630 = vector.shape_cast %629 : vector<1x2x256xf32> to vector<2x256xf32>
    %631 = vector.broadcast %628 : f32 to vector<2x256xf32>
    %632 = arith.mulf %631, %630 : vector<2x256xf32>
    %633 = arith.addf %621, %632 : vector<2x256xf32>
    %c96_274 = arith.constant 96 : index
    %634 = memref.load %arg1[%c96_274] : memref<98xf32, #tpu.memory_space<smem>>
    %c1_275 = arith.constant 1 : index
    %c0_276 = arith.constant 0 : index
    %c178_277 = arith.constant 178 : index
    %635 = vector.load %arg4[%c1_275, %c0_276, %c178_277] : memref<2x2x512xf32, #tpu.memory_space<vmem>>, vector<1x2x256xf32>
    %636 = vector.shape_cast %635 : vector<1x2x256xf32> to vector<2x256xf32>
    %637 = vector.broadcast %634 : f32 to vector<2x256xf32>
    %638 = arith.mulf %637, %636 : vector<2x256xf32>
    %639 = arith.addf %627, %638 : vector<2x256xf32>
    %640 = arith.addf %633, %639 : vector<2x256xf32>
    %cst_278 = arith.constant 0.000000e+00 : f32
    %641 = vector.shape_cast %553 : vector<1x256xi1> to vector<1x256xi1>
    %642 = vector.broadcast %641 : vector<1x256xi1> to vector<2x256xi1>
    %643 = vector.broadcast %cst_278 : f32 to vector<2x256xf32>
    %644 = arith.select %642, %640, %643 : vector<2x256xi1>, vector<2x256xf32>
    %645 = arith.addf %544, %644 : vector<2x256xf32>
    %c3_i32 = arith.constant 3 : i32
    %646 = vector.broadcast %c3_i32 : i32 to vector<1x256xi32>
    %647 = arith.addi %38, %646 : vector<1x256xi32>
    %c0_i32_279 = arith.constant 0 : i32
    %648 = vector.broadcast %c0_i32_279 : i32 to vector<1x256xi32>
    %649 = arith.cmpi sge, %647, %648 : vector<1x256xi32>
    %c3_i32_280 = arith.constant 3 : i32
    %650 = vector.broadcast %c3_i32_280 : i32 to vector<1x256xi32>
    %651 = arith.addi %38, %650 : vector<1x256xi32>
    %c15_i32_281 = arith.constant 15 : i32
    %652 = vector.broadcast %c15_i32_281 : i32 to vector<1x256xi32>
    %653 = arith.cmpi sle, %651, %652 : vector<1x256xi32>
    %654 = arith.andi %649, %653 : vector<1x256xi1>
    %cst_282 = arith.constant 0.000000e+00 : f32
    %655 = vector.broadcast %cst_282 : f32 to vector<2x256xf32>
    %cst_283 = arith.constant 0.000000e+00 : f32
    %656 = vector.broadcast %cst_283 : f32 to vector<2x256xf32>
    %c6 = arith.constant 6 : index
    %657 = memref.load %arg1[%c6] : memref<98xf32, #tpu.memory_space<smem>>
    %c0_284 = arith.constant 0 : index
    %c0_285 = arith.constant 0 : index
    %c83 = arith.constant 83 : index
    %658 = vector.load %arg4[%c0_284, %c0_285, %c83] : memref<2x2x512xf32, #tpu.memory_space<vmem>>, vector<1x2x256xf32>
    %659 = vector.shape_cast %658 : vector<1x2x256xf32> to vector<2x256xf32>
    %660 = vector.broadcast %657 : f32 to vector<2x256xf32>
    %661 = arith.mulf %660, %659 : vector<2x256xf32>
    %662 = arith.addf %655, %661 : vector<2x256xf32>
    %c55 = arith.constant 55 : index
    %663 = memref.load %arg1[%c55] : memref<98xf32, #tpu.memory_space<smem>>
    %c1_286 = arith.constant 1 : index
    %c0_287 = arith.constant 0 : index
    %c83_288 = arith.constant 83 : index
    %664 = vector.load %arg4[%c1_286, %c0_287, %c83_288] : memref<2x2x512xf32, #tpu.memory_space<vmem>>, vector<1x2x256xf32>
    %665 = vector.shape_cast %664 : vector<1x2x256xf32> to vector<2x256xf32>
    %666 = vector.broadcast %663 : f32 to vector<2x256xf32>
    %667 = arith.mulf %666, %665 : vector<2x256xf32>
    %668 = arith.addf %656, %667 : vector<2x256xf32>
    %c13 = arith.constant 13 : index
    %669 = memref.load %arg1[%c13] : memref<98xf32, #tpu.memory_space<smem>>
    %c0_289 = arith.constant 0 : index
    %c0_290 = arith.constant 0 : index
    %c99 = arith.constant 99 : index
    %670 = vector.load %arg4[%c0_289, %c0_290, %c99] : memref<2x2x512xf32, #tpu.memory_space<vmem>>, vector<1x2x256xf32>
    %671 = vector.shape_cast %670 : vector<1x2x256xf32> to vector<2x256xf32>
    %672 = vector.broadcast %669 : f32 to vector<2x256xf32>
    %673 = arith.mulf %672, %671 : vector<2x256xf32>
    %674 = arith.addf %662, %673 : vector<2x256xf32>
    %c62 = arith.constant 62 : index
    %675 = memref.load %arg1[%c62] : memref<98xf32, #tpu.memory_space<smem>>
    %c1_291 = arith.constant 1 : index
    %c0_292 = arith.constant 0 : index
    %c99_293 = arith.constant 99 : index
    %676 = vector.load %arg4[%c1_291, %c0_292, %c99_293] : memref<2x2x512xf32, #tpu.memory_space<vmem>>, vector<1x2x256xf32>
    %677 = vector.shape_cast %676 : vector<1x2x256xf32> to vector<2x256xf32>
    %678 = vector.broadcast %675 : f32 to vector<2x256xf32>
    %679 = arith.mulf %678, %677 : vector<2x256xf32>
    %680 = arith.addf %668, %679 : vector<2x256xf32>
    %c20 = arith.constant 20 : index
    %681 = memref.load %arg1[%c20] : memref<98xf32, #tpu.memory_space<smem>>
    %c0_294 = arith.constant 0 : index
    %c0_295 = arith.constant 0 : index
    %c115 = arith.constant 115 : index
    %682 = vector.load %arg4[%c0_294, %c0_295, %c115] : memref<2x2x512xf32, #tpu.memory_space<vmem>>, vector<1x2x256xf32>
    %683 = vector.shape_cast %682 : vector<1x2x256xf32> to vector<2x256xf32>
    %684 = vector.broadcast %681 : f32 to vector<2x256xf32>
    %685 = arith.mulf %684, %683 : vector<2x256xf32>
    %686 = arith.addf %674, %685 : vector<2x256xf32>
    %c69 = arith.constant 69 : index
    %687 = memref.load %arg1[%c69] : memref<98xf32, #tpu.memory_space<smem>>
    %c1_296 = arith.constant 1 : index
    %c0_297 = arith.constant 0 : index
    %c115_298 = arith.constant 115 : index
    %688 = vector.load %arg4[%c1_296, %c0_297, %c115_298] : memref<2x2x512xf32, #tpu.memory_space<vmem>>, vector<1x2x256xf32>
    %689 = vector.shape_cast %688 : vector<1x2x256xf32> to vector<2x256xf32>
    %690 = vector.broadcast %687 : f32 to vector<2x256xf32>
    %691 = arith.mulf %690, %689 : vector<2x256xf32>
    %692 = arith.addf %680, %691 : vector<2x256xf32>
    %c27 = arith.constant 27 : index
    %693 = memref.load %arg1[%c27] : memref<98xf32, #tpu.memory_space<smem>>
    %c0_299 = arith.constant 0 : index
    %c0_300 = arith.constant 0 : index
    %c131 = arith.constant 131 : index
    %694 = vector.load %arg4[%c0_299, %c0_300, %c131] : memref<2x2x512xf32, #tpu.memory_space<vmem>>, vector<1x2x256xf32>
    %695 = vector.shape_cast %694 : vector<1x2x256xf32> to vector<2x256xf32>
    %696 = vector.broadcast %693 : f32 to vector<2x256xf32>
    %697 = arith.mulf %696, %695 : vector<2x256xf32>
    %698 = arith.addf %686, %697 : vector<2x256xf32>
    %c76 = arith.constant 76 : index
    %699 = memref.load %arg1[%c76] : memref<98xf32, #tpu.memory_space<smem>>
    %c1_301 = arith.constant 1 : index
    %c0_302 = arith.constant 0 : index
    %c131_303 = arith.constant 131 : index
    %700 = vector.load %arg4[%c1_301, %c0_302, %c131_303] : memref<2x2x512xf32, #tpu.memory_space<vmem>>, vector<1x2x256xf32>
    %701 = vector.shape_cast %700 : vector<1x2x256xf32> to vector<2x256xf32>
    %702 = vector.broadcast %699 : f32 to vector<2x256xf32>
    %703 = arith.mulf %702, %701 : vector<2x256xf32>
    %704 = arith.addf %692, %703 : vector<2x256xf32>
    %c34 = arith.constant 34 : index
    %705 = memref.load %arg1[%c34] : memref<98xf32, #tpu.memory_space<smem>>
    %c0_304 = arith.constant 0 : index
    %c0_305 = arith.constant 0 : index
    %c147 = arith.constant 147 : index
    %706 = vector.load %arg4[%c0_304, %c0_305, %c147] : memref<2x2x512xf32, #tpu.memory_space<vmem>>, vector<1x2x256xf32>
    %707 = vector.shape_cast %706 : vector<1x2x256xf32> to vector<2x256xf32>
    %708 = vector.broadcast %705 : f32 to vector<2x256xf32>
    %709 = arith.mulf %708, %707 : vector<2x256xf32>
    %710 = arith.addf %698, %709 : vector<2x256xf32>
    %c83_306 = arith.constant 83 : index
    %711 = memref.load %arg1[%c83_306] : memref<98xf32, #tpu.memory_space<smem>>
    %c1_307 = arith.constant 1 : index
    %c0_308 = arith.constant 0 : index
    %c147_309 = arith.constant 147 : index
    %712 = vector.load %arg4[%c1_307, %c0_308, %c147_309] : memref<2x2x512xf32, #tpu.memory_space<vmem>>, vector<1x2x256xf32>
    %713 = vector.shape_cast %712 : vector<1x2x256xf32> to vector<2x256xf32>
    %714 = vector.broadcast %711 : f32 to vector<2x256xf32>
    %715 = arith.mulf %714, %713 : vector<2x256xf32>
    %716 = arith.addf %704, %715 : vector<2x256xf32>
    %c41 = arith.constant 41 : index
    %717 = memref.load %arg1[%c41] : memref<98xf32, #tpu.memory_space<smem>>
    %c0_310 = arith.constant 0 : index
    %c0_311 = arith.constant 0 : index
    %c163 = arith.constant 163 : index
    %718 = vector.load %arg4[%c0_310, %c0_311, %c163] : memref<2x2x512xf32, #tpu.memory_space<vmem>>, vector<1x2x256xf32>
    %719 = vector.shape_cast %718 : vector<1x2x256xf32> to vector<2x256xf32>
    %720 = vector.broadcast %717 : f32 to vector<2x256xf32>
    %721 = arith.mulf %720, %719 : vector<2x256xf32>
    %722 = arith.addf %710, %721 : vector<2x256xf32>
    %c90 = arith.constant 90 : index
    %723 = memref.load %arg1[%c90] : memref<98xf32, #tpu.memory_space<smem>>
    %c1_312 = arith.constant 1 : index
    %c0_313 = arith.constant 0 : index
    %c163_314 = arith.constant 163 : index
    %724 = vector.load %arg4[%c1_312, %c0_313, %c163_314] : memref<2x2x512xf32, #tpu.memory_space<vmem>>, vector<1x2x256xf32>
    %725 = vector.shape_cast %724 : vector<1x2x256xf32> to vector<2x256xf32>
    %726 = vector.broadcast %723 : f32 to vector<2x256xf32>
    %727 = arith.mulf %726, %725 : vector<2x256xf32>
    %728 = arith.addf %716, %727 : vector<2x256xf32>
    %c48 = arith.constant 48 : index
    %729 = memref.load %arg1[%c48] : memref<98xf32, #tpu.memory_space<smem>>
    %c0_315 = arith.constant 0 : index
    %c0_316 = arith.constant 0 : index
    %c179 = arith.constant 179 : index
    %730 = vector.load %arg4[%c0_315, %c0_316, %c179] : memref<2x2x512xf32, #tpu.memory_space<vmem>>, vector<1x2x256xf32>
    %731 = vector.shape_cast %730 : vector<1x2x256xf32> to vector<2x256xf32>
    %732 = vector.broadcast %729 : f32 to vector<2x256xf32>
    %733 = arith.mulf %732, %731 : vector<2x256xf32>
    %734 = arith.addf %722, %733 : vector<2x256xf32>
    %c97_317 = arith.constant 97 : index
    %735 = memref.load %arg1[%c97_317] : memref<98xf32, #tpu.memory_space<smem>>
    %c1_318 = arith.constant 1 : index
    %c0_319 = arith.constant 0 : index
    %c179_320 = arith.constant 179 : index
    %736 = vector.load %arg4[%c1_318, %c0_319, %c179_320] : memref<2x2x512xf32, #tpu.memory_space<vmem>>, vector<1x2x256xf32>
    %737 = vector.shape_cast %736 : vector<1x2x256xf32> to vector<2x256xf32>
    %738 = vector.broadcast %735 : f32 to vector<2x256xf32>
    %739 = arith.mulf %738, %737 : vector<2x256xf32>
    %740 = arith.addf %728, %739 : vector<2x256xf32>
    %741 = arith.addf %734, %740 : vector<2x256xf32>
    %cst_321 = arith.constant 0.000000e+00 : f32
    %742 = vector.shape_cast %654 : vector<1x256xi1> to vector<1x256xi1>
    %743 = vector.broadcast %742 : vector<1x256xi1> to vector<2x256xi1>
    %744 = vector.broadcast %cst_321 : f32 to vector<2x256xf32>
    %745 = arith.select %743, %741, %744 : vector<2x256xi1>, vector<2x256xf32>
    %746 = arith.addf %645, %745 : vector<2x256xf32>
    %747 = arith.negf %746 : vector<2x256xf32>
    %748 = math.exp %747 : vector<2x256xf32>
    %cst_322 = arith.constant 1.000000e+00 : f32
    %749 = vector.broadcast %cst_322 : f32 to vector<2x256xf32>
    %750 = arith.addf %749, %748 : vector<2x256xf32>
    %751 = arith.divf %749, %750 : vector<2x256xf32>
    %c0_323 = arith.constant 0 : index
    %c0_324 = arith.constant 0 : index
    %752 = vector.load %arg3[%c0_323, %c0_324] : memref<2x256xf32, #tpu.memory_space<vmem>>, vector<2x256xf32>
    tpu.vector_store %arg3[%c0_323, %c0_324], %751 {strides = array<i32>} : memref<2x256xf32, #tpu.memory_space<vmem>>, vector<2x256xf32>,
    return
  }
  func.func @transform_0(%arg0: i32) -> i32 {
    %c0_i32 = arith.constant 0 : i32
    %c0_i32_0 = arith.constant 0 : i32
    return %c0_i32 : i32
  }
  func.func @transform_1(%arg0: i32) -> (i32, i32) {
    %c0_i32 = arith.constant 0 : i32
    %c0_i32_0 = arith.constant 0 : i32
    return %arg0, %c0_i32 : i32, i32
  }
  func.func @transform_2(%arg0: i32) -> (i32, i32) {
    %c0_i32 = arith.constant 0 : i32
    %c0_i32_0 = arith.constant 0 : i32
    return %arg0, %c0_i32 : i32, i32
  }
}

</mosaic_0001>

<bundles_post_ra>
// kernel: tpu_custom_call.1
= control target key start
LH: loop header
LB: loop body
LE: loop exit
PB: predicated region body
PF: predicated region fallthrough
CT: control target
= control target key end

     0   :  { %7 = vsyncpa [#allocation6], 0  ;;  %s1976_s0 = inlined_call_operand.hbm [shape: f32[98], index: 0, kind: input, shape index: {}]   ;;  %s1977_s1 = inlined_call_operand.hbm [shape: f32[2,1024], index: 1, kind: input, shape index: {}]   ;;  %s1978_s2 = inlined_call_operand.hbm [shape: f32[2,256], index: 2, kind: output, shape index: {}]  }
   0x1   :  { %8 = vsyncpa [#allocation4], 0 }
   0x2   :  { %9 = vsyncpa [#allocation5], 0  ;;  %s15_s11 = sshll.u32 %s1976_s0, 4  ;;  %s24_s14 = sshll.u32 %s1977_s1, 4  ;;  %s16_s11 = int_to_ptr.hbm [resolvable:$true] %s15_s11  ;;  %s25_s14 = int_to_ptr.hbm [resolvable:$true] %s24_s14 }
   0x3   :  { %s1496_s15 = smov [#allocation3]   ;;  %s1497_s16 = smov [#allocation7]  }
   0x4   :  { %18 = dma.hbm_to_smem %s16_s11, 16, %s1496_s15, [#allocation6]  }
   0x5   :  { %s26_s17 = sshll.u32 %s1497_s16, 4  ;;  %s27_s17 = int_to_ptr.vmem [resolvable:$true] %s26_s17 }
   0x6   :  { %29 = dma.hbm_to_vmem [thread:$0]  %s25_s14, 256, %s27_s17, [#allocation4]  }
   0x7   :  { %1490 = dma.done.wait [#allocation6], 16  }
   0x8   :  { %1491 = vsyncadd [#allocation6], 4294967280 }
   0x9   :  { %1492 = dma.done.wait [#allocation4], 256  }
   0xa   :  { %1493 = vsyncadd [#allocation4], 4294967040 }
   0xb   :  { %38 = sfence }
   0xc   :  { %v39_v0 = vld [vmem:[#allocation7] sm:$0xf]  ;;  %v40_v1 = vld [vmem:[#allocation7 + $0x4] sm:$0xf]  ;;  %v41_v2 = vld [vmem:[#allocation7 + $0x8] sm:$0xf] }
   0xd   :  { %v43_v3 = vmax.f32 %v39_v0, %v41_v2  ;;  %v44_v4 = vld [vmem:[#allocation7 + $0xc] sm:$0xf]  ;;  %s1311_s0 = sld [smem:[#allocation3 + $0x3f]]  ;;  %v42_v5 = vadd.f32 %v41_v2, %v39_v0  ;;  %v1498_v8 = vmov 0.0   ;;  %s1499_s22 = smov 96   ;;  %vm109_vm0 = vcmask 916480  }
   0xe   :  { %v45_v6 = vadd.f32 %v44_v4, %v40_v1  ;;  %v46_v7 = vmax.f32 %v40_v1, %v44_v4  ;;  %51 = vst [vmem:[#allocation2 + $0x8] sm:$0x3] %v1498_v8  ;;  %s1309_s1 = sld [smem:[#allocation3 + $0x38]]  ;;  %s1500_s23 = smov 112   ;;  %vm130_vm1 = vcmask 785408   ;;  %vm151_vm2 = vcmask 654336  }
   0xf   :  { %50 = vst [vmem:[#allocation2] sm:$0x3] %v1498_v8  ;;  %s1313_s18 = sld [smem:[#allocation3 + $0x46]]  ;;  %s1501_s25 = smov 80   ;;  %vm173_vm3 = vcmask 523264   ;;  %vm195_vm4 = vcmask 392192  }
  0x10   :  { %v48_v9 = vmax.f32 %v43_v3, %v46_v7  ;;  %52 = vst [vmem:[#allocation2 + $0x6] sm:$0x3] %v1498_v8  ;;  %v47_v10 = vadd.f32 %v45_v6, %v42_v5  ;;  %s1315_s19 = sld [smem:[#allocation3 + $0x4d]]  ;;  %s1502_s28 = smov 64   ;;  %vm216_vm5 = vcmask 261120   ;;  %vm246_vm6 = vcmask 416768  }
  0x11   :  { %53 = vst [vmem:[#allocation2 + $0xe] sm:$0x3] %v1498_v8  ;;  %s1308_s20 = sld [smem:[#allocation3 + $0x7]]  ;;  %s1503_s5 = smov 48   ;;  %vm411_vm7 = vcmask 408576   ;;  %vm576_vm12 = vcmask 400384  }
  0x12   :  { %56 = vst [vmem:[#allocation2 + $0xa] sm:$0xf] %v48_v9  ;;  %v49_v11 = vmul.f32 0.25, %v47_v10  ;;  %s1312_s21 = sld [smem:[#allocation3 + $0x15]]  ;;  %s1504_s8 = smov 32   ;;  %vm905_vm15 = vcmask 384000  }
  0x13   :  { %v135_v12 = vstv %s1311_s0  ;;  %s1310_s24 = sld [smem:[#allocation3 + $0xe]] }
  0x14   :  { %54 = vst [vmem:[#allocation2 + $0x2] sm:$0xf] %v49_v11  ;;  %v114_v13 = vstv %s1309_s1  ;;  %s1314_s26 = sld [smem:[#allocation3 + $0x1c]] }
  0x15   :  { %v156_v14 = vstv %s1313_s18  ;;  %s1316_s27 = sld [smem:[#allocation3 + $0x23]] }
  0x16   :  { %v179_v20 = vstv %s1315_s19  ;;  %s1318_s29 = sld [smem:[#allocation3 + $0x2a]] }
  0x17   :  { %v103_v22 = vstv %s1308_s20  ;;  %s1317_s30 = sld [smem:[#allocation3 + $0x54]] }
  0x18   :  { %v145_v23 = vstv %s1312_s21  ;;  %s1319_s3 = sld [smem:[#allocation3 + $0x5b]] }
  0x19   :  { %v1533_v15 = vld [vmem:[#allocation2 + $0x8] sm:$0x3f]  ;;  %v124_v27 = vstv %s1310_s24  ;;  %s1323_s4 = sld [smem:[#allocation3 + $0x39]] }
  0x1a   :  { %v136_v16 = vmul.f32 %v135_v12, %v1533_v15  ;;  %v115_v17 = vmul.f32 %v114_v13, %v1533_v15  ;;  %v157_v18 = vmul.f32 %v156_v14, %v1533_v15  ;;  %v178_v19 = vld [vmem:[#allocation2 + $0xa] sm:$0x3f]  ;;  %v167_v29 = vstv %s1314_s26  ;;  %s1322_s6 = sld [smem:[#allocation3 + $0x8]] }
  0x1b   :  { %v1541_v21 = vld [vmem:[#allocation2] sm:$0x3f]  ;;  %v180_v24 = vmul.f32 %v179_v20, %v178_v19  ;;  %v189_v30 = vstv %s1316_s27  ;;  %s1324_s7 = sld [smem:[#allocation3 + $0xf]]  ;;  %v1555_v40 = vld [vmem:[#allocation2 + $0x8] sm:$0x3f] }
  0x1c   :  { %138 = vrot.lane.b32.xlu1 %v136_v16, %s1499_s22  ;;  %117 = vrot.lane.b32.xlu0 %v115_v17, %s1500_s23  ;;  %v104_v25 = vmul.f32 %v103_v22, %v1541_v21  ;;  %v146_v26 = vmul.f32 %v145_v23, %v1541_v21  ;;  %v166_v28 = vld [vmem:[#allocation2 + $0x2] sm:$0x3f]  ;;  %v125_v31 = vmul.f32 %v124_v27, %v1541_v21  ;;  %v210_v34 = vstv %s1318_s29  ;;  %s1326_s9 = sld [smem:[#allocation3 + $0x16]]  ;;  %v345_v54 = vld [vmem:[#allocation2 + $0xa] sm:$0x3f] }
  0x1d   :  { %159 = vrot.lane.b32.xlu2 %v157_v18, %s1501_s25  ;;  %v168_v32 = vmul.f32 %v167_v29, %v166_v28  ;;  %v190_v33 = vmul.f32 %v189_v30, %v166_v28  ;;  %v200_v35 = vstv %s1317_s30  ;;  %v211_v37 = vmul.f32 %v210_v34, %v166_v28  ;;  %v1557_v42 = vld [vmem:[#allocation2] sm:$0x3f]  ;;  %s1325_s10 = sld [smem:[#allocation3 + $0x40]]  ;;  %v1577_v4 = vld [vmem:[#allocation2 + $0x8] sm:$0x3f] }
  0x1e   :  { %v221_v36 = vstv %s1319_s3  ;;  %v201_v38 = vmul.f32 %v200_v35, %v178_v19  ;;  %s1327_s11 = sld [smem:[#allocation3 + $0x47]]  ;;  %v334_v56 = vld [vmem:[#allocation2 + $0x2] sm:$0x3f]  ;;  %v1601_v35 = vld [vmem:[#allocation2 + $0x8] sm:$0x3f] }
  0x1f   :  { %v222_v39 = vmul.f32 %v221_v36, %v178_v19  ;;  %v284_v41 = vstv %s1323_s4  ;;  %s1329_s12 = sld [smem:[#allocation3 + $0x4e]]  ;;  %v1579_v6 = vld [vmem:[#allocation2] sm:$0x3f]  ;;  %v510_v19 = vld [vmem:[#allocation2 + $0xa] sm:$0x3f] }
  0x20   :  { %v274_v43 = vstv %s1322_s6  ;;  %v285_v45 = vmul.f32 %v284_v41, %v1555_v40  ;;  %s1328_s13 = sld [smem:[#allocation3 + $0x1d]]  ;;  %v499_v22 = vld [vmem:[#allocation2 + $0x2] sm:$0x3f] }
  0x21   :  { %v294_v44 = vstv %s1324_s7  ;;  %v275_v46 = vmul.f32 %v274_v43, %v1557_v42  ;;  %s1330_s14 = sld [smem:[#allocation3 + $0x24]]  ;;  %v1599_v34 = vld [vmem:[#allocation2] sm:$0x3f] }
  0x22   :  { %v295_v47 = vmul.f32 %v294_v44, %v1557_v42  ;;  %v314_v48 = vstv %s1326_s9  ;;  %s1332_s15 = sld [smem:[#allocation3 + $0x2b]] }
  0x23   :  { %v304_v49 = vstv %s1325_s10  ;;  %v315_v51 = vmul.f32 %v314_v48, %v1557_v42  ;;  %s1331_s16 = sld [smem:[#allocation3 + $0x55]]  ;;  %v653_v48 = vld [vmem:[#allocation2 + $0xa] sm:$0xf] }
  0x24   :  { %182 = vrot.lane.b32.xlu1 %v180_v24, %s1502_s28  ;;  %106 = vrot.lane.b32.xlu0 %v104_v25, %s1500_s23  ;;  %v324_v50 = vstv %s1327_s11  ;;  %v305_v52 = vmul.f32 %v304_v49, %v1555_v40  ;;  %s1333_s17 = sld [smem:[#allocation3 + $0x5c]] }
  0x25   :  { %148 = vrot.lane.b32.xlu2 %v146_v26, %s1501_s25  ;;  %v325_v53 = vmul.f32 %v324_v50, %v1555_v40  ;;  %v346_v55 = vstv %s1329_s12  ;;  %s1337_s0 = sld [smem:[#allocation3 + $0x3a]] }
  0x26   :  { %v335_v57 = vstv %s1328_s13  ;;  %v347_v59 = vmul.f32 %v346_v55, %v345_v54  ;;  %s1336_s1 = sld [smem:[#allocation3 + $0x9]]  ;;  %v675_v55 = vld [vmem:[#allocation2 + $0xa] sm:$0x3f] }
  0x27   :  { %v356_v58 = vstv %s1330_s14  ;;  %v336_v60 = vmul.f32 %v335_v57, %v334_v56  ;;  %s1338_s18 = sld [smem:[#allocation3 + $0x10]] }
  0x28   :  { %v357_v61 = vmul.f32 %v356_v58, %v334_v56  ;;  %v376_v62 = vstv %s1332_s15  ;;  %s1340_s19 = sld [smem:[#allocation3 + $0x17]] }
  0x29   :  { %v366_v63 = vstv %s1331_s16  ;;  %v377_v1 = vmul.f32 %v376_v62, %v334_v56  ;;  %s1339_s20 = sld [smem:[#allocation3 + $0x41]] }
  0x2a   :  { %v386_v0 = vstv %s1333_s17  ;;  %v367_v2 = vmul.f32 %v366_v63, %v345_v54  ;;  %s1341_s21 = sld [smem:[#allocation3 + $0x48]]  ;;  %v1624_v63 = vld [vmem:[#allocation2] sm:$0x3f] }
  0x2b   :  { %v387_v3 = vmul.f32 %v386_v0, %v345_v54  ;;  %v449_v5 = vstv %s1337_s0  ;;  %s1343_s24 = sld [smem:[#allocation3 + $0x4f]]  ;;  %v664_v54 = vld [vmem:[#allocation2 + $0x2] sm:$0x3f] }
  0x2c   :  { %127 = vrot.lane.b32.xlu1 %v125_v31, %s1499_s22  ;;  %170 = vrot.lane.b32.xlu0 %v168_v32, %s1502_s28  ;;  %v439_v7 = vstv %s1336_s1  ;;  %v450_v9 = vmul.f32 %v449_v5, %v1577_v4  ;;  %s1342_s26 = sld [smem:[#allocation3 + $0x1e]]  ;;  %v1626_v5 = vld [vmem:[#allocation2 + $0x8] sm:$0x3f] }
  0x2d   :  { %192 = vrot.lane.b32.xlu2 %v190_v33, %s1503_s5  ;;  %v459_v8 = vstv %s1338_s18  ;;  %v440_v10 = vmul.f32 %v439_v7, %v1579_v6  ;;  %s1344_s27 = sld [smem:[#allocation3 + $0x25]] }
  0x2e   :  { %v460_v11 = vmul.f32 %v459_v8, %v1579_v6  ;;  %v479_v12 = vstv %s1340_s19  ;;  %s1346_s29 = sld [smem:[#allocation3 + $0x2c]] }
  0x2f   :  { %v469_v13 = vstv %s1339_s20  ;;  %v480_v16 = vmul.f32 %v479_v12, %v1579_v6  ;;  %s1345_s30 = sld [smem:[#allocation3 + $0x56]] }
  0x30   :  { %v489_v14 = vstv %s1341_s21  ;;  %v470_v17 = vmul.f32 %v469_v13, %v1577_v4  ;;  %s1347_s3 = sld [smem:[#allocation3 + $0x5d]] }
  0x31   :  { %v490_v18 = vmul.f32 %v489_v14, %v1577_v4  ;;  %v511_v20 = vstv %s1343_s24  ;;  %s1351_s4 = sld [smem:[#allocation3 + $0x3b]] }
  0x32   :  { %v500_v23 = vstv %s1342_s26  ;;  %v512_v25 = vmul.f32 %v511_v20, %v510_v19  ;;  %s1350_s6 = sld [smem:[#allocation3 + $0xa]] }
  0x33   :  { %v521_v24 = vstv %s1344_s27  ;;  %v501_v26 = vmul.f32 %v500_v23, %v499_v22  ;;  %s1352_s7 = sld [smem:[#allocation3 + $0x11]] }
  0x34   :  { %213 = vrot.lane.b32.xlu1 %v211_v37, %s1504_s8  ;;  %203 = vrot.lane.b32.xlu0 %v201_v38, %s1503_s5  ;;  %v522_v27 = vmul.f32 %v521_v24, %v499_v22  ;;  %v541_v28 = vstv %s1346_s29  ;;  %s1354_s9 = sld [smem:[#allocation3 + $0x18]] }
  0x35   :  { %224 = vrot.lane.b32.xlu2 %v222_v39, %s1504_s8  ;;  %v531_v29 = vstv %s1345_s30  ;;  %v542_v31 = vmul.f32 %v541_v28, %v499_v22  ;;  %s1353_s10 = sld [smem:[#allocation3 + $0x42]] }
  0x36   :  { %v551_v30 = vstv %s1347_s3  ;;  %v532_v32 = vmul.f32 %v531_v29, %v510_v19  ;;  %s1355_s11 = sld [smem:[#allocation3 + $0x49]] }
  0x37   :  { %v552_v33 = vmul.f32 %v551_v30, %v510_v19  ;;  %v612_v36 = vstv %s1351_s4  ;;  %s1357_s12 = sld [smem:[#allocation3 + $0x50]] }
  0x38   :  { %v602_v37 = vstv %s1350_s6  ;;  %v613_v41 = vmul.f32 %v612_v36, %v1601_v35  ;;  %s1356_s13 = sld [smem:[#allocation3 + $0x1f]]  ;;  %s1505_s6 = smov 51  }
  0x39   :  { %v622_v38 = vstv %s1352_s7  ;;  %v603_v43 = vmul.f32 %v602_v37, %v1599_v34  ;;  %s1358_s14 = sld [smem:[#allocation3 + $0x26]] }
  0x3a   :  { %v623_v44 = vmul.f32 %v622_v38, %v1599_v34  ;;  %s1364_s15 = sld [smem:[#allocation3 + $0xb]] }
  0x3b   :  { %s1359_s16 = sld [smem:[#allocation3 + $0x57]] }
  0x3c   :  { %287 = vrot.lane.b32.xlu1 %v285_v45, %s1500_s23  ;;  %277 = vrot.lane.b32.xlu0 %v275_v46, %s1500_s23  ;;  %v642_v45 = vld [vmem:[#allocation2 + $0x2] sm:$0xf]  ;;  %v643_v46 = vstv %s1354_s9  ;;  %v654_v49 = vstv %s1355_s11  ;;  %s1365_s17 = sld [smem:[#allocation3 + $0x3c]] }
  0x3d   :  { %297 = vrot.lane.b32.xlu2 %v295_v47, %s1499_s22  ;;  %v632_v47 = vstv %s1353_s10  ;;  %v676_v56 = vstv %s1357_s12  ;;  %s1621_s0 = sld [smem:[#allocation3 + $0x5e]]  ;;  %s1506_s10 = smov 50  }
  0x3e   :  { %v665_v57 = vstv %s1356_s13  ;;  %s1360_s1 = sld [smem:[#allocation3 + $0x2d]] }
  0x3f   :  { %v686_v58 = vstv %s1358_s14  ;;  %s1366_s18 = sld [smem:[#allocation3 + $0x12]] }
  0x40   :  { %v687_v62 = vmul.f32 %v686_v58, %v664_v54  ;;  %v768_v0 = vstv %s1364_s15  ;;  %s1307_s19 = sld [smem:[#allocation3 + $0x31]] }
  0x41   :  { %s92_s20 = sld [smem:[#allocation3]] }
  0x42   :  { %v778_v7 = vstv %s1365_s17  ;;  %s1632_s21 = sld [smem:[#allocation3 + $0x4a]] }
  0x43   :  { %s1636_s24 = sld [smem:[#allocation3 + $0x19]]  ;;  %v716_v12 = vstv %s1621_s0 }
  0x44   :  { %317 = vrot.lane.b32.xlu1 %v315_v51, %s1501_s25  ;;  %307 = vrot.lane.b32.xlu0 %v305_v52, %s1499_s22  ;;  %v644_v51 = vmul.f32 %v643_v46, %v642_v45  ;;  %v633_v52 = vmul.f32 %v632_v47, %v1601_v35  ;;  %v706_v13 = vstv %s1360_s1  ;;  %s1640_s26 = sld [smem:[#allocation3 + $0x43]]  ;;  %v717_v22 = vmul.f32 %v716_v12, %v675_v55 }
  0x45   :  { %327 = vrot.lane.b32.xlu2 %v325_v53, %s1501_s25  ;;  %v655_v53 = vmul.f32 %v654_v49, %v653_v48  ;;  %v707_v23 = vmul.f32 %v706_v13, %v664_v54  ;;  %s1647_s27 = sld [smem:[#allocation3 + $0x51]] }
  0x46   :  { %s1653_s29 = sld [smem:[#allocation3 + $0x20]] }
  0x47   :  { %v94_v24 = vstv %s92_s20  ;;  %s1663_s30 = sld [smem:[#allocation3 + $0x27]] }
  0x48   :  { %v95_v29 = vmul.f32 %v94_v24, %v1541_v21  ;;  %v820_v30 = vstv %s1632_s21  ;;  %s1320_s3 = sld [smem:[#allocation3 + $0x1]] }
  0x49   :  { %v809_v36 = vstv %s1636_s24  ;;  %s1321_s4 = sld [smem:[#allocation3 + $0x32]] }
  0x4a   :  { %v798_v37 = vstv %s1640_s26  ;;  %s1334_s7 = sld [smem:[#allocation3 + $0x2]] }
  0x4b   :  { %s1335_s9 = sld [smem:[#allocation3 + $0x33]] }
  0x4c   :  { %349 = vrot.lane.b32.xlu1 %v347_v59, %s1502_s28  ;;  %338 = vrot.lane.b32.xlu0 %v336_v60, %s1502_s28  ;;  %v677_v60 = vmul.f32 %v676_v56, %v675_v55  ;;  %s1349_s11 = sld [smem:[#allocation3 + $0x34]] }
  0x4d   :  { %359 = vrot.lane.b32.xlu2 %v357_v61, %s1503_s5  ;;  %v666_v61 = vmul.f32 %v665_v57, %v664_v54  ;;  %s1348_s12 = sld [smem:[#allocation3 + $0x3]] }
  0x4e   :  { %s1742_s13 = sld [smem:[#allocation3 + $0xc]] }
  0x4f   :  { %s1744_s14 = sld [smem:[#allocation3 + $0x3d]] }
  0x50   :  { %s1746_s15 = sld [smem:[#allocation3 + $0x58]] }
  0x51   :  { %s1750_s17 = sld [smem:[#allocation3 + $0x5f]] }
  0x52   :  { %s1756_s0 = sld [smem:[#allocation3 + $0x13]] }
  0x53   :  { %s1761_s1 = sld [smem:[#allocation3 + $0x2e]] }
  0x54   :  { %379 = vrot.lane.b32.xlu1 %v377_v1, %s1504_s8  ;;  %369 = vrot.lane.b32.xlu0 %v367_v2, %s1503_s5  ;;  %v696_v1 = vstv %s1359_s16  ;;  %s1507_s16 = smov 49   ;;  %s1786_s20 = sld [smem:[#allocation3 + $0x44]] }
  0x55   :  { %389 = vrot.lane.b32.xlu2 %v387_v3, %s1504_s8  ;;  %s1799_s21 = sld [smem:[#allocation3 + $0x52]] }
  0x56   :  { %s1807_s24 = sld [smem:[#allocation3 + $0x28]] }
  0x57   :  { %s1384_s26 = sld [smem:[#allocation3 + $0x21]] }
  0x5c   :  { %452 = vrot.lane.b32.xlu1 %v450_v9, %s1500_s23  ;;  %442 = vrot.lane.b32.xlu0 %v440_v10, %s1500_s23  ;;  %v769_v9 = vmul.f32 %v768_v0, %v1624_v63  ;;  %v697_v10 = vmul.f32 %v696_v1, %v675_v55 }
  0x5d   :  { %462 = vrot.lane.b32.xlu2 %v460_v11, %s1499_s22  ;;  %v779_v11 = vmul.f32 %v778_v7, %v1626_v5 }
  0x64   :  { %482 = vrot.lane.b32.xlu1 %v480_v16, %s1501_s25  ;;  %472 = vrot.lane.b32.xlu0 %v470_v17, %s1499_s22  ;;  %v788_v17 = vstv %s1366_s18  ;;  %s1775_s18 = sld [smem:[#allocation3 + $0x1a]] }
  0x65   :  { %492 = vrot.lane.b32.xlu2 %v490_v18, %s1501_s25  ;;  %v99_v18 = vstv %s1307_s19  ;;  %s1781_s19 = sld [smem:[#allocation3 + $0x4b]] }
  0x6c   :  { %514 = vrot.lane.b32.xlu1 %v512_v25, %s1502_s28  ;;  %503 = vrot.lane.b32.xlu0 %v501_v26, %s1502_s28  ;;  %v789_v26 = vmul.f32 %v788_v17, %v1624_v63 }
  0x6d   :  { %524 = vrot.lane.b32.xlu2 %v522_v27, %s1503_s5  ;;  %v100_v27 = vmul.f32 %v99_v18, %v1533_v15  ;;  %v1659_v15 = vld [vmem:[#allocation2 + $0x2] sm:$0x3f] }
  0x6e   :  { %v810_v49 = vmul.f32 %v809_v36, %v1659_v15 }
  0x74   :  { %544 = vrot.lane.b32.xlu1 %v542_v31, %s1504_s8  ;;  %534 = vrot.lane.b32.xlu0 %v532_v32, %s1503_s5 }
  0x75   :  { %554 = vrot.lane.b32.xlu2 %v552_v33, %s1504_s8  ;;  %v1657_v33 = vld [vmem:[#allocation2 + $0xa] sm:$0x3f] }
  0x76   :  { %v821_v48 = vmul.f32 %v820_v30, %v1657_v33 }
  0x77   :  { %v1603_v39 = vpop.permute.xlu2 %159 }
  0x7c   :  { %615 = vrot.lane.b32.xlu1 %v613_v41, %s1500_s23  ;;  %605 = vrot.lane.b32.xlu0 %v603_v43, %s1500_s23  ;;  %v161_v43 = vrot.slane %v1603_v39, 2 }
  0x7d   :  { %625 = vrot.lane.b32.xlu2 %v623_v44, %s1499_s22 }
  0x7f   :  { %v1611_v50 = vpop.permute.xlu2 %148 }
  0x80   :  { %v150_v44 = vrot.slane %v1611_v50, 2 }
  0x82   :  { %v152_v58 = vsel %vm151_vm2, %v1611_v50, %v150_v44  ;;  %v830_v50 = vstv %s1653_s29  ;;  %v270_v44 = vstv %s1321_s4  ;;  %s1393_s29 = sld [smem:[#allocation3 + $0x3e]] }
  0x83   :  { %s1394_s4 = sld [smem:[#allocation3 + $0x14]] }
  0x84   :  { %646 = vrot.lane.b32.xlu1 %v644_v51, %s1501_s25  ;;  %635 = vrot.lane.b32.xlu0 %v633_v52, %s1499_s22  ;;  %v799_v51 = vmul.f32 %v798_v37, %v1626_v5 }
  0x85   :  { %657 = vrot.lane.b32.xlu2 %v655_v53, %s1501_s25 }
  0x87   :  { %v1617_v59 = vpop.permute.xlu2 %192 }
  0x8c   :  { %679 = vrot.lane.b32.xlu1 %v677_v60, %s1502_s28  ;;  %668 = vrot.lane.b32.xlu0 %v666_v61, %s1502_s28  ;;  %v194_v60 = vrot.slane %v1617_v59, 6  ;;  %v162_v61 = vsel %vm151_vm2, %v1603_v39, %v161_v43  ;;  %v850_v39 = vstv %s1663_s30  ;;  %s1387_s30 = sld [smem:[#allocation3 + $0x59]] }
  0x8d   :  { %689 = vrot.lane.b32.xlu2 %v687_v62, %s1503_s5 }
  0x8e   :  { %v139_v2 = vpop.permute.xlu1 %138  ;;  %v118_v3 = vpop.permute.xlu0 %117 }
  0x8f   :  { %v1628_v8 = vpop.permute.xlu2 %224  ;;  %v119_v19 = vrot.slane %v118_v3, 2  ;;  %v140_v31 = vrot.slane %v139_v2, 2 }
  0x90   :  { %v226_v12 = vrot.slane %v1628_v8, 6 }
  0x91   :  { %v120_v28 = vsel %vm109_vm0, %v118_v3, %v119_v19  ;;  %v141_v52 = vsel %vm130_vm1, %v139_v2, %v140_v31  ;;  %v840_v2 = vstv %s1647_s27  ;;  %s1818_s27 = sld [smem:[#allocation3 + $0xd]] }
  0x92   :  { %v122_v21 = vadd.f32 %v120_v28, %v100_v27  ;;  %v841_v19 = vmul.f32 %v840_v2, %v1657_v33 }
  0x94   :  { %771 = vrot.lane.b32.xlu1 %v769_v9, %s1500_s23  ;;  %699 = vrot.lane.b32.xlu0 %v697_v10, %s1503_s5  ;;  %v143_v56 = vadd.f32 %v141_v52, %v122_v21  ;;  %v265_v21 = vstv %s1320_s3  ;;  %v271_v52 = vmul.f32 %v270_v44, %v1555_v40  ;;  %v435_v44 = vstv %s1335_s9  ;;  %s1389_s3 = sld [smem:[#allocation3 + $0x60]] }
  0x95   :  { %781 = vrot.lane.b32.xlu2 %v779_v11, %s1500_s23  ;;  %v196_v11 = vsel %vm195_vm4, %v194_v60, %v1617_v59  ;;  %v227_v59 = vsel %vm216_vm5, %v226_v12, %v1628_v8  ;;  %s1397_s9 = sld [smem:[#allocation3 + $0x4c]] }
  0x96   :  { %v183_v14 = vpop.permute.xlu1 %182  ;;  %v107_v16 = vpop.permute.xlu0 %106  ;;  %v164_v3 = vadd.f32 %v162_v61, %v143_v56 }
  0x97   :  { %v1642_v20 = vpop.permute.xlu2 %297  ;;  %v108_v25 = vrot.slane %v107_v16, 2  ;;  %v184_v53 = vrot.slane %v183_v14, 6 }
  0x99   :  { %v110_v32 = vsel %vm109_vm0, %v107_v16, %v108_v25  ;;  %v185_v0 = vsel %vm173_vm3, %v184_v53, %v183_v14  ;;  %v851_v25 = vmul.f32 %v850_v39, %v1659_v15  ;;  %v299_v53 = vrot.slane %v1642_v20, 2 }
  0x9a   :  { %v112_v47 = vadd.f32 %v110_v32, %v95_v29  ;;  %v187_v17 = vadd.f32 %v185_v0, %v164_v3 }
  0x9c   :  { %719 = vrot.lane.b32.xlu1 %v717_v22, %s1504_s8  ;;  %709 = vrot.lane.b32.xlu0 %v707_v23, %s1504_s8  ;;  %v831_v22 = vmul.f32 %v830_v50, %v1659_v15 }
  0x9d   :  { %791 = vrot.lane.b32.xlu2 %v789_v26, %s1499_s22 }
  0x9e   :  { %v128_v38 = vpop.permute.xlu1 %127  ;;  %v171_v41 = vpop.permute.xlu0 %170 }
  0x9f   :  { %v129_v45 = vrot.slane %v128_v38, 2  ;;  %v1667_v46 = vpop.permute.xlu2 %327  ;;  %v172_v55 = vrot.slane %v171_v41, 6 }
  0xa0   :  { %v329_v0 = vrot.slane %v1667_v46, 2 }
  0xa1   :  { %v131_v54 = vsel %vm130_vm1, %v128_v38, %v129_v45  ;;  %v174_v1 = vsel %vm173_vm3, %v172_v55, %v171_v41 }
  0xa2   :  { %v133_v57 = vadd.f32 %v131_v54, %v112_v47  ;;  %v266_v47 = vmul.f32 %v265_v21, %v1557_v42  ;;  %v300_v42 = vsel %vm130_vm1, %v1642_v20, %v299_v53 }
  0xa4   :  { %v154_v62 = vadd.f32 %v152_v58, %v133_v57  ;;  %812 = vrot.lane.b32.xlu1 %v810_v49, %s1501_s25  ;;  %801 = vrot.lane.b32.xlu0 %v799_v51, %s1499_s22 }
  0xa5   :  { %823 = vrot.lane.b32.xlu2 %v821_v48, %s1501_s25 }
  0xa6   :  { %v176_v7 = vadd.f32 %v174_v1, %v154_v62  ;;  %v214_v9 = vpop.permute.xlu1 %213  ;;  %v204_v10 = vpop.permute.xlu0 %203 }
  0xa7   :  { %v215_v13 = vrot.slane %v214_v9, 6  ;;  %v205_v16 = vrot.slane %v204_v10, 6  ;;  %v1690_v14 = vpop.permute.xlu2 %359 }
  0xa8   :  { %v198_v18 = vadd.f32 %v196_v11, %v176_v7 }
  0xa9   :  { %v217_v23 = vsel %vm216_vm5, %v215_v13, %v214_v9  ;;  %v206_v24 = vsel %vm195_vm4, %v205_v16, %v204_v10  ;;  %v330_v9 = vsel %vm151_vm2, %v1667_v46, %v329_v0  ;;  %v361_v10 = vrot.slane %v1690_v14, 6 }
  0xaa   :  { %v208_v26 = vadd.f32 %v206_v24, %v187_v17  ;;  %v219_v27 = vadd.f32 %v217_v23, %v198_v18 }
  0xab   :  { %v362_v23 = vsel %vm195_vm4, %v361_v10, %v1690_v14  ;;  %v430_v14 = vstv %s1334_s7  ;;  %s1396_s7 = sld [smem:[#allocation3 + $0x1b]] }
  0xac   :  { %v229_v28 = vadd.f32 %v227_v59, %v208_v26  ;;  %843 = vrot.lane.b32.xlu1 %v841_v19, %s1502_s28  ;;  %833 = vrot.lane.b32.xlu0 %v831_v22, %s1502_s28 }
  0xad   :  { %853 = vrot.lane.b32.xlu2 %v851_v25, %s1503_s5 }
  0xae   :  { %v230_v29 = vadd.f32 %v229_v28, %v219_v27  ;;  %v288_v30 = vpop.permute.xlu1 %287  ;;  %v278_v31 = vpop.permute.xlu0 %277 }
  0xaf   :  { %v390_v32 = vpop.permute.xlu2 %389  ;;  %v279_v38 = vrot.slane %v278_v31, 2  ;;  %v289_v45 = vrot.slane %v288_v30, 2 }
  0xb0   :  { %236 = vst [vmem:[#allocation1] ss:$4 sm:$0xff] %v230_v29  ;;  %v391_v17 = vrot.slane %v390_v32, 6 }
  0xb1   :  { %v280_v48 = vsel %vm109_vm0, %v278_v31, %v279_v38  ;;  %v290_v54 = vsel %vm109_vm0, %v288_v30, %v289_v45 }
  0xb2   :  { %v282_v56 = vadd.f32 %v280_v48, %v266_v47  ;;  %v292_v62 = vadd.f32 %v290_v54, %v271_v52  ;;  %v392_v59 = vsel %vm216_vm5, %v391_v17, %v390_v32  ;;  %v431_v47 = vmul.f32 %v430_v14, %v1579_v6 }
  0xb3   :  { %v436_v52 = vmul.f32 %v435_v44, %v1577_v4  ;;  %v593_v14 = vstv %s1348_s12  ;;  %v1752_v44 = vld [vmem:[#allocation2] sm:$0x3f]  ;;  %s1398_s12 = sld [smem:[#allocation3 + $0x22]] }
  0xb4   :  { %v302_v2 = vadd.f32 %v300_v42, %v282_v56 }
  0xb6   :  { %v318_v36 = vpop.permute.xlu1 %317  ;;  %v308_v37 = vpop.permute.xlu0 %307 }
  0xb7   :  { %v239_v8 = vld.sshfl [vmem:[#allocation1 + $0x10] sm:$0xff pattern:$0x73625140]  ;;  %v238_v41 = vld.sshfl [vmem:[#allocation1 + $0x8] sm:$0xff pattern:$0x73625140]  ;;  %v1704_v51 = vpop.permute.xlu2 %462 }
  0xb8   :  { %244 = vrot.lane.b32.xlu2 %v239_v8, %s1505_s6  ;;  %v237_v43 = vld.sshfl [vmem:[#allocation1] sm:$0xff pattern:$0x73625140]  ;;  %242 = vrot.lane.b32.xlu1 %v238_v41, %s1505_s6  ;;  %v309_v49 = vrot.slane %v308_v37, 2  ;;  %v319_v55 = vrot.slane %v318_v36, 2  ;;  %v464_v53 = vrot.slane %v1704_v51, 2 }
  0xb9   :  { %240 = vrot.lane.b32.xlu0 %v237_v43, %s1505_s6  ;;  %s1388_s6 = sld [smem:[#allocation3 + $0x2f]] }
  0xba   :  { %v310_v60 = vsel %vm130_vm1, %v308_v37, %v309_v49  ;;  %v320_v1 = vsel %vm151_vm2, %v318_v36, %v319_v55  ;;  %v465_v6 = vsel %vm130_vm1, %v1704_v51, %v464_v53 }
  0xbb   :  { %v312_v50 = vadd.f32 %v310_v60, %v292_v62  ;;  %v322_v7 = vadd.f32 %v320_v1, %v302_v2 }
  0xbd   :  { %v332_v12 = vadd.f32 %v330_v9, %v312_v50 }
  0xbe   :  { %v350_v57 = vpop.permute.xlu1 %349  ;;  %v339_v58 = vpop.permute.xlu0 %338 }
  0xbf   :  { %v340_v61 = vrot.slane %v339_v58, 6  ;;  %v351_v40 = vrot.slane %v350_v57, 6  ;;  %v493_v11 = vpop.permute.xlu2 %492 }
  0xc0   :  { %v494_v42 = vrot.slane %v493_v11, 2 }
  0xc1   :  { %v341_v3 = vsel %vm173_vm3, %v340_v61, %v339_v58  ;;  %v352_v39 = vsel %vm173_vm3, %v351_v40, %v350_v57 }
  0xc2   :  { %v343_v20 = vadd.f32 %v341_v3, %v322_v7  ;;  %v354_v22 = vadd.f32 %v352_v39, %v332_v12  ;;  %v495_v7 = vsel %vm151_vm2, %v493_v11, %v494_v42 }
  0xc4   :  { %v364_v25 = vadd.f32 %v362_v23, %v343_v20 }
  0xc6   :  { %v380_v13 = vpop.permute.xlu1 %379  ;;  %v370_v16 = vpop.permute.xlu0 %369 }
  0xc7   :  { %v381_v18 = vrot.slane %v380_v13, 6  ;;  %v371_v19 = vrot.slane %v370_v16, 6  ;;  %v525_v36 = vpop.permute.xlu2 %524 }
  0xc8   :  { %v526_v9 = vrot.slane %v525_v36, 6 }
  0xc9   :  { %v382_v24 = vsel %vm216_vm5, %v381_v18, %v380_v13  ;;  %v372_v46 = vsel %vm195_vm4, %v371_v19, %v370_v16 }
  0xca   :  { %v374_v26 = vadd.f32 %v372_v46, %v354_v22  ;;  %v384_v27 = vadd.f32 %v382_v24, %v364_v25  ;;  %v527_v19 = vsel %vm195_vm4, %v526_v9, %v525_v36 }
  0xcc   :  { %v394_v28 = vadd.f32 %v392_v59, %v374_v26 }
  0xce   :  { %v395_v29 = vadd.f32 %v394_v28, %v384_v27  ;;  %v453_v30 = vpop.permute.xlu1 %452  ;;  %v443_v31 = vpop.permute.xlu0 %442 }
  0xcf   :  { %v444_v38 = vrot.slane %v443_v31, 2  ;;  %v454_v32 = vrot.slane %v453_v30, 2  ;;  %v555_v45 = vpop.permute.xlu2 %554 }
  0xd0   :  { %401 = vst [vmem:[#allocation1] ss:$4 sm:$0xff] %v395_v29  ;;  %v556_v13 = vrot.slane %v555_v45, 6 }
  0xd1   :  { %v445_v48 = vsel %vm109_vm0, %v443_v31, %v444_v38  ;;  %v455_v54 = vsel %vm109_vm0, %v453_v30, %v454_v32  ;;  %v933_v32 = vstv %s1742_s13  ;;  %s1402_s13 = sld [smem:[#allocation3 + $0x30]] }
  0xd2   :  { %v447_v56 = vadd.f32 %v445_v48, %v431_v47  ;;  %v457_v62 = vadd.f32 %v455_v54, %v436_v52  ;;  %v557_v11 = vsel %vm216_vm5, %v556_v13, %v555_v45  ;;  %v943_v45 = vstv %s1744_s14  ;;  %s1403_s14 = sld [smem:[#allocation3 + $0x61]] }
  0xd3   :  { %v594_v48 = vmul.f32 %v593_v14, %v1599_v34 }
  0xd4   :  { %v467_v4 = vadd.f32 %v465_v6, %v447_v56  ;;  %v1766_v56 = vld [vmem:[#allocation2 + $0x8] sm:$0x3f] }
  0xd6   :  { %v483_v37 = vpop.permute.xlu1 %482  ;;  %v473_v21 = vpop.permute.xlu0 %472 }
  0xd7   :  { %v404_v8 = vld.sshfl [vmem:[#allocation1 + $0x10] sm:$0xff pattern:$0x73625140]  ;;  %v403_v41 = vld.sshfl [vmem:[#allocation1 + $0x8] sm:$0xff pattern:$0x73625140]  ;;  %v1733_v2 = vpop.permute.xlu2 %625 }
  0xd8   :  { %409 = vrot.lane.b32.xlu2 %v404_v8, %s1506_s10  ;;  %v402_v43 = vld.sshfl [vmem:[#allocation1] sm:$0xff pattern:$0x73625140]  ;;  %407 = vrot.lane.b32.xlu1 %v403_v41, %s1506_s10  ;;  %v474_v49 = vrot.slane %v473_v21, 2  ;;  %v484_v55 = vrot.slane %v483_v37, 2  ;;  %v627_v52 = vrot.slane %v1733_v2, 2 }
  0xd9   :  { %405 = vrot.lane.b32.xlu0 %v402_v43, %s1506_s10  ;;  %s1395_s10 = sld [smem:[#allocation3 + $0x45]] }
  0xda   :  { %v475_v60 = vsel %vm130_vm1, %v473_v21, %v474_v49  ;;  %v485_v0 = vsel %vm151_vm2, %v483_v37, %v484_v55  ;;  %v598_v21 = vstv %s1349_s11  ;;  %v860_v49 = vstv %s1746_s15  ;;  %s1399_s11 = sld [smem:[#allocation3 + $0x53]] }
  0xdb   :  { %v477_v40 = vadd.f32 %v475_v60, %v457_v62  ;;  %v487_v3 = vadd.f32 %v485_v0, %v467_v4  ;;  %v599_v47 = vmul.f32 %v598_v21, %v1601_v35  ;;  %v944_v35 = vmul.f32 %v943_v45, %v1766_v56  ;;  %s1401_s15 = sld [smem:[#allocation3 + $0x5a]] }
  0xdc   :  { %v861_v34 = vmul.f32 %v860_v49, %v1657_v33  ;;  %v628_v6 = vsel %vm130_vm1, %v1733_v2, %v627_v52  ;;  %v880_v4 = vstv %s1750_s17  ;;  %s1391_s17 = sld [smem:[#allocation3 + $0x37]] }
  0xdd   :  { %v497_v39 = vadd.f32 %v495_v7, %v477_v40  ;;  %v953_v40 = vstv %s1756_s0  ;;  %v870_v7 = vstv %s1761_s1  ;;  %s1509_s0 = smov 46   ;;  %s1510_s1 = smov 45  }
  0xde   :  { %v515_v57 = vpop.permute.xlu1 %514  ;;  %v504_v58 = vpop.permute.xlu0 %503  ;;  %v871_v13 = vmul.f32 %v870_v7, %v1659_v15  ;;  %v974_v15 = vstv %s1775_s18  ;;  %s1511_s18 = smov [#allocation8]  }
  0xdf   :  { %v505_v61 = vrot.slane %v504_v58, 6  ;;  %v516_v1 = vrot.slane %v515_v57, 6  ;;  %v658_v59 = vpop.permute.xlu2 %657 }
  0xe0   :  { %v659_v42 = vrot.slane %v658_v59, 6 }
  0xe1   :  { %v506_v50 = vsel %vm173_vm3, %v505_v61, %v504_v58  ;;  %v517_v10 = vsel %vm173_vm3, %v516_v1, %v515_v57  ;;  %v934_v57 = vmul.f32 %v933_v32, %v1752_v44 }
  0xe2   :  { %v508_v12 = vadd.f32 %v506_v50, %v487_v3  ;;  %v519_v18 = vadd.f32 %v517_v10, %v497_v39  ;;  %v660_v9 = vsel %vm151_vm2, %v659_v42, %v658_v59  ;;  %v963_v59 = vstv %s1786_s20 }
  0xe3   :  { %v1025_v42 = vstv %s1387_s30 }
  0xe4   :  { %v529_v24 = vadd.f32 %v527_v19, %v508_v12 }
  0xe6   :  { %v545_v20 = vpop.permute.xlu1 %544  ;;  %v535_v51 = vpop.permute.xlu0 %534 }
  0xe7   :  { %v546_v16 = vrot.slane %v545_v20, 6  ;;  %v536_v17 = vrot.slane %v535_v51, 6  ;;  %v1748_v41 = vpop.permute.xlu2 %689 }
  0xe9   :  { %v547_v22 = vsel %vm216_vm5, %v546_v16, %v545_v20  ;;  %v537_v23 = vsel %vm195_vm4, %v536_v17, %v535_v51  ;;  %v881_v20 = vmul.f32 %v880_v4, %v1657_v33  ;;  %v954_v51 = vmul.f32 %v953_v40, %v1752_v44  ;;  %v1803_v33 = vld [vmem:[#allocation2 + $0x2] sm:$0x3f] }
  0xea   :  { %v539_v46 = vadd.f32 %v537_v23, %v519_v18  ;;  %v549_v25 = vadd.f32 %v547_v22, %v529_v24  ;;  %v691_v22 = vrot.slane %v1748_v41, 6 }
  0xec   :  { %v559_v26 = vadd.f32 %v557_v11, %v539_v46  ;;  %v985_v11 = vstv %s1781_s19  ;;  %s1294_s19 = sshll.u32 %s1511_s18, 4  ;;  %s1295_s19 = int_to_ptr.vmem [resolvable:$true] %s1294_s19 }
  0xee   :  { %v560_v27 = vadd.f32 %v559_v26, %v549_v25  ;;  %v616_v28 = vpop.permute.xlu1 %615  ;;  %v606_v29 = vpop.permute.xlu0 %605 }
  0xef   :  { %v617_v30 = vrot.slane %v616_v28, 2  ;;  %v607_v31 = vrot.slane %v606_v29, 2  ;;  %v1783_v50 = vpop.permute.xlu2 %781 }
  0xf0   :  { %566 = vst [vmem:[#allocation1] ss:$4 sm:$0xff] %v560_v27  ;;  %v692_v27 = vsel %vm195_vm4, %v691_v22, %v1748_v41  ;;  %v1128_v22 = vstv %s1395_s10 }
  0xf1   :  { %v618_v53 = vsel %vm109_vm0, %v616_v28, %v617_v30  ;;  %v608_v54 = vsel %vm109_vm0, %v606_v29, %v607_v31  ;;  %v984_v29 = vld [vmem:[#allocation2 + $0xa] sm:$0x3f]  ;;  %v975_v31 = vmul.f32 %v974_v15, %v1803_v33 }
  0xf2   :  { %v620_v58 = vadd.f32 %v618_v53, %v599_v47  ;;  %v610_v60 = vadd.f32 %v608_v54, %v594_v48  ;;  %v1005_v47 = vstv %s1799_s21  ;;  %v1015_v48 = vstv %s1807_s24  ;;  %s1296_s24 = sshll.u32 %s1978_s2, 4  ;;  %s1297_s24 = int_to_ptr.hbm [resolvable:$true] %s1296_s24 }
  0xf3   :  { %v995_v53 = vstv %s1384_s26  ;;  %v1026_v40 = vmul.f32 %v1025_v42, %v984_v29 }
  0xf4   :  { %v630_v3 = vadd.f32 %v628_v6, %v610_v60  ;;  %v1108_v6 = vstv %s1393_s29 }
  0xf6   :  { %v647_v36 = vpop.permute.xlu1 %646  ;;  %v636_v37 = vpop.permute.xlu0 %635 }
  0xf7   :  { %v569_v38 = vld.sshfl [vmem:[#allocation1 + $0x10] sm:$0xff pattern:$0x73625140]  ;;  %v568_v8 = vld.sshfl [vmem:[#allocation1 + $0x8] sm:$0xff pattern:$0x73625140]  ;;  %v1813_v30 = vpop.permute.xlu2 %791 }
  0xf8   :  { %574 = vrot.lane.b32.xlu2 %v569_v38, %s1507_s16  ;;  %572 = vrot.lane.b32.xlu1 %v568_v8, %s1507_s16  ;;  %v567_v43 = vld.sshfl [vmem:[#allocation1] sm:$0xff pattern:$0x73625140]  ;;  %v637_v55 = vrot.slane %v636_v37, 2  ;;  %v648_v0 = vrot.slane %v647_v36, 6 }
  0xf9   :  { %570 = vrot.lane.b32.xlu0 %v567_v43, %s1507_s16  ;;  %s1390_s16 = sld [smem:[#allocation3 + $0x6]] }
  0xfa   :  { %v638_v1 = vsel %vm130_vm1, %v636_v37, %v637_v55  ;;  %v649_v10 = vsel %vm151_vm2, %v648_v0, %v647_v36  ;;  %v986_v36 = vmul.f32 %v985_v11, %v984_v29  ;;  %v964_v37 = vmul.f32 %v963_v59, %v1766_v56  ;;  %v1840_v0 = vld [vmem:[#allocation2 + $0x8] sm:$0x3f] }
  0xfb   :  { %v640_v2 = vadd.f32 %v638_v1, %v620_v58  ;;  %v651_v16 = vadd.f32 %v649_v10, %v630_v3  ;;  %v1006_v55 = vmul.f32 %v1005_v47, %v984_v29  ;;  %v1109_v4 = vmul.f32 %v1108_v6, %v1840_v0 }
  0xfc   :  { %v1118_v10 = vstv %s1394_s4  ;;  %v1170_v59 = vstv %s1399_s11 }
  0xfd   :  { %v662_v17 = vadd.f32 %v660_v9, %v640_v2  ;;  %v1045_v9 = vstv %s1389_s3 }
  0xfe   :  { %v680_v61 = vpop.permute.xlu1 %679  ;;  %v669_v62 = vpop.permute.xlu0 %668 }
  0xff   :  { %v681_v39 = vrot.slane %v680_v61, 6  ;;  %v670_v12 = vrot.slane %v669_v62, 6 }
 0x100   :  { %936 = vrot.lane.b32.xlu1 %v934_v57, %s1500_s23  ;;  %946 = vrot.lane.b32.xlu2 %v944_v35, %s1500_s23  ;;  %v1016_v57 = vmul.f32 %v1015_v48, %v1803_v33  ;;  %v996_v35 = vmul.f32 %v995_v53, %v1803_v33 }
 0x101   :  { %863 = vrot.lane.b32.xlu0 %v861_v34, %s1503_s5  ;;  %v682_v23 = vsel %vm173_vm3, %v681_v39, %v680_v61  ;;  %v671_v24 = vsel %vm173_vm3, %v670_v12, %v669_v62  ;;  %v1828_v34 = vpop.permute.xlu2 %823  ;;  %v1837_v61 = vld [vmem:[#allocation2] sm:$0x3f]  ;;  %v1098_v62 = vstv %s1818_s27  ;;  %v1035_v39 = vstv %s1388_s6 }
 0x102   :  { %v684_v25 = vadd.f32 %v682_v23, %v662_v17  ;;  %v673_v26 = vadd.f32 %v671_v24, %v651_v16  ;;  %v1099_v1 = vmul.f32 %v1098_v62, %v1837_v61  ;;  %v1046_v12 = vmul.f32 %v1045_v9, %v984_v29 }
 0x103   :  { %v1139_v16 = vstv %s1396_s7  ;;  %v1150_v17 = vstv %s1397_s9 }
 0x104   :  { %v694_v38 = vadd.f32 %v692_v27, %v673_v26  ;;  %v1129_v26 = vmul.f32 %v1128_v22, %v1840_v0 }
 0x106   :  { %v1793_v18 = vpop.permute.xlu1 %771  ;;  %v700_v19 = vpop.permute.xlu0 %699 }
 0x107   :  { %v701_v46 = vrot.slane %v700_v19, 6 }
 0x108   :  { %883 = vrot.lane.b32.xlu1 %v881_v20, %s1504_s8  ;;  %956 = vrot.lane.b32.xlu2 %v954_v51, %s1499_s22  ;;  %v1119_v20 = vmul.f32 %v1118_v10, %v1837_v61  ;;  %v1036_v51 = vmul.f32 %v1035_v39, %v1803_v33 }
 0x109   :  { %873 = vrot.lane.b32.xlu0 %v871_v13, %s1504_s8  ;;  %v702_v28 = vsel %vm195_vm4, %v701_v46, %v700_v19  ;;  %v1844_v3 = vpop.permute.xlu2 %853  ;;  %v1138_v13 = vld [vmem:[#allocation2 + $0x2] sm:$0x3f]  ;;  %v1149_v46 = vld [vmem:[#allocation2 + $0xa] sm:$0x3f] }
 0x10a   :  { %v704_v21 = vadd.f32 %v702_v28, %v684_v25  ;;  %v1140_v11 = vmul.f32 %v1139_v16, %v1138_v13  ;;  %v1151_v25 = vmul.f32 %v1150_v17, %v1149_v46  ;;  %v1160_v28 = vstv %s1398_s12 }
 0x10b   :  { %v1171_v29 = vmul.f32 %v1170_v59, %v1149_v46 }
 0x10e   :  { %v720_v14 = vpop.permute.xlu1 %719  ;;  %v710_v8 = vpop.permute.xlu0 %709 }
 0x10f   :  { %v721_v43 = vrot.slane %v720_v14, 6  ;;  %v711_v32 = vrot.slane %v710_v8, 6 }
 0x110   :  { %977 = vrot.lane.b32.xlu1 %v975_v31, %s1501_s25  ;;  %988 = vrot.lane.b32.xlu2 %v986_v36, %s1501_s25  ;;  %v1161_v36 = vmul.f32 %v1160_v28, %v1138_v13 }
 0x111   :  { %966 = vrot.lane.b32.xlu0 %v964_v37, %s1499_s22  ;;  %v722_v41 = vsel %vm216_vm5, %v721_v43, %v720_v14  ;;  %v712_v45 = vsel %vm216_vm5, %v711_v32, %v710_v8  ;;  %v57_v37 = vlaneseq  ;;  %v1210_v14 = vstv %s1403_s14 }
 0x112   :  { %v724_v49 = vadd.f32 %v722_v41, %v704_v21  ;;  %v714_v52 = vadd.f32 %v712_v45, %v694_v38  ;;  %v245_v19 = vpop.permute.xlu2 %244  ;;  %v1200_v21 = vstv %s1402_s13  ;;  %v1190_v8 = vstv %s1401_s15 }
 0x113   :  { %v58_v38 = vand.u32 127, %v57_v37  ;;  %v1201_v43 = vmul.f32 %v1200_v21, %v1138_v13  ;;  %v1211_v32 = vmul.f32 %v1210_v14, %v1149_v46  ;;  %v1191_v41 = vmul.f32 %v1190_v8, %v1149_v46 }
 0x114   :  { %v725_v54 = vadd.f32 %v724_v49, %v714_v52 }
 0x115   :  { %v59_v45 = vadd.s32 128, %v58_v38  ;;  %v1870_v48 = vand.u32 15, %v58_v38 }
 0x116   :  { %731 = vst [vmem:[#allocation1] ss:$4 sm:$0xff] %v725_v54  ;;  %v1830_v58 = vpop.permute.xlu1 %812  ;;  %v1832_v60 = vpop.permute.xlu0 %801 }
 0x117   :  { %v1868_v47 = vand.u32 15, %v59_v45  ;;  %v84_v52 = vadd.s32 4294967293, %v1870_v48  ;;  %v255_v54 = vadd.s32 4294967294, %v1870_v48  ;;  %v420_v22 = vadd.s32 4294967295, %v1870_v48 }
 0x118   :  { %1008 = vrot.lane.b32.xlu1 %v1006_v55, %s1502_s28  ;;  %1018 = vrot.lane.b32.xlu2 %v1016_v57, %s1503_s5  ;;  %v803_v59 = vrot.slane %v1832_v60, 2  ;;  %v814_v14 = vrot.slane %v1830_v58, 6 }
 0x119   :  { %998 = vrot.lane.b32.xlu0 %v996_v35, %s1502_s28  ;;  %v85_v49 = vadd.s32 4294967293, %v1868_v47  ;;  %v256_v53 = vadd.s32 4294967294, %v1868_v47  ;;  %vm86_vm9 = vcmp.ge.s32.totalorder %v84_v52, 0  ;;  %vm257_vm11 = vcmp.ge.s32.totalorder %v255_v54, 0 }
 0x11a   :  { %v421_v16 = vadd.s32 4294967295, %v1868_v47  ;;  %vm422_vm14 = vcmp.ge.s32.totalorder %v420_v22, 0  ;;  %v804_v8 = vsel %vm130_vm1, %v1832_v60, %v803_v59 }
 0x11b   :  { %vm87_vm8 = vcmp.ge.s32.totalorder %v85_v49, 0  ;;  %vm258_vm10 = vcmp.ge.s32.totalorder %v256_v53, 0 }
 0x11c   :  { %vm423_vm13 = vcmp.ge.s32.totalorder %v421_v16, 0 }
 0x11d   :  { %v734_v55 = vld.sshfl [vmem:[#allocation1 + $0x10] sm:$0xff pattern:$0x73625140]  ;;  %v733_v57 = vld.sshfl [vmem:[#allocation1 + $0x8] sm:$0xff pattern:$0x73625140] }
 0x11e   :  { %v1849_v2 = vpop.permute.xlu1 %843  ;;  %v1851_v7 = vpop.permute.xlu0 %833 }
 0x11f   :  { %v835_v45 = vrot.slane %v1851_v7, 6  ;;  %v845_v52 = vrot.slane %v1849_v2, 6 }
 0x120   :  { %1101 = vrot.lane.b32.xlu1 %v1099_v1, %s1500_s23  ;;  %1111 = vrot.lane.b32.xlu2 %v1109_v4, %s1500_s23  ;;  %s1400_s23 = sld [smem:[#allocation3 + $0x29]] }
 0x121   :  { %1028 = vrot.lane.b32.xlu0 %v1026_v40, %s1503_s5  ;;  %v836_v60 = vsel %vm173_vm3, %v835_v45, %v1851_v7 }
 0x126   :  { %v1180_v27 = vstv %s1400_s23 }
 0x127   :  { %v1181_v31 = vmul.f32 %v1180_v27, %v1138_v13 }
 0x128   :  { %1048 = vrot.lane.b32.xlu1 %v1046_v12, %s1504_s8  ;;  %1121 = vrot.lane.b32.xlu2 %v1119_v20, %s1499_s22  ;;  %v732_v20 = vld.sshfl [vmem:[#allocation1] sm:$0xff pattern:$0x73625140] }
 0x129   :  { %1038 = vrot.lane.b32.xlu0 %v1036_v51, %s1504_s8 }
 0x12a   :  { %v243_v23 = vpop.permute.xlu1 %242 }
 0x12b   :  { %v241_v24 = vpop.permute.xlu0 %240  ;;  %v248_v15 = vsel %vm246_vm6, %v243_v23, %v245_v19  ;;  %v773_v19 = vrot.slane %v1793_v18, 2 }
 0x12c   :  { %v247_v33 = vsel %vm246_vm6, %v241_v24, %v243_v23  ;;  %v252_v4 = vsel %vm87_vm8, %v248_v15, 0.0  ;;  %v783_v24 = vrot.slane %v1783_v50, 2  ;;  %vm1235_vm6 = vcmask 367616  }
 0x12d   :  { %v251_v40 = vsel %vm86_vm9, %v247_v33, 0.0  ;;  %v793_v33 = vrot.slane %v1813_v30, 2 }
 0x130   :  { %1142 = vrot.lane.b32.xlu1 %v1140_v11, %s1501_s25  ;;  %1153 = vrot.lane.b32.xlu2 %v1151_v25, %s1501_s25  ;;  %s1363_s25 = sld [smem:[#allocation3 + $0x35]]  ;;  %v774_v11 = vsel %vm109_vm0, %v1793_v18, %v773_v19  ;;  %v794_v18 = vsel %vm130_vm1, %v1813_v30, %v793_v33 }
 0x131   :  { %1131 = vrot.lane.b32.xlu0 %v1129_v26, %s1499_s22  ;;  %s1362_s22 = sld [smem:[#allocation3 + $0x4]]  ;;  %v784_v26 = vsel %vm109_vm0, %v1783_v50, %v783_v24  ;;  %v825_v50 = vrot.slane %v1828_v34, 6 }
 0x132   :  { %v410_v35 = vpop.permute.xlu2 %409 }
 0x133   :  { %v826_v30 = vsel %vm151_vm2, %v825_v50, %v1828_v34 }
 0x136   :  { %v764_v23 = vstv %s1363_s25 }
 0x137   :  { %v759_v17 = vstv %s1362_s22  ;;  %v765_v15 = vmul.f32 %v764_v23, %v1626_v5 }
 0x138   :  { %1173 = vrot.lane.b32.xlu1 %v1171_v29, %s1502_s28  ;;  %1183 = vrot.lane.b32.xlu2 %v1181_v31, %s1503_s5  ;;  %v760_v46 = vmul.f32 %v759_v17, %v1624_v63 }
 0x139   :  { %1163 = vrot.lane.b32.xlu0 %v1161_v36, %s1502_s28  ;;  %v786_v21 = vadd.f32 %v784_v26, %v765_v15  ;;  %s1376_s28 = sld [smem:[#allocation3 + $0x5]] }
 0x13a   :  { %v776_v63 = vadd.f32 %v774_v11, %v760_v46 }
 0x13f   :  { %v924_v23 = vstv %s1376_s28 }
 0x140   :  { %1203 = vrot.lane.b32.xlu1 %v1201_v43, %s1504_s8  ;;  %1213 = vrot.lane.b32.xlu2 %v1211_v32, %s1504_s8  ;;  %v796_v43 = vadd.f32 %v794_v18, %v776_v63  ;;  %v815_v32 = vsel %vm151_vm2, %v814_v14, %v1830_v58  ;;  %v846_v58 = vsel %vm173_vm3, %v845_v52, %v1849_v2  ;;  %s1508_s8 = smov 47  }
 0x141   :  { %1193 = vrot.lane.b32.xlu0 %v1191_v41, %s1503_s5  ;;  %v806_v41 = vadd.f32 %v804_v8, %v786_v21  ;;  %v925_v59 = vmul.f32 %v924_v23, %v1752_v44 }
 0x142   :  { %v817_v54 = vadd.f32 %v815_v32, %v796_v43 }
 0x148   :  { %739 = vrot.lane.b32.xlu1 %v734_v55, %s1503_s5 }
 0x149   :  { %737 = vrot.lane.b32.xlu0 %v733_v57, %s1503_s5  ;;  %v855_v57 = vrot.slane %v1844_v3, 6 }
 0x14a   :  { %v408_v62 = vpop.permute.xlu1 %407 }
 0x14b   :  { %v406_v6 = vpop.permute.xlu0 %405  ;;  %v413_v42 = vsel %vm411_vm7, %v408_v62, %v410_v35  ;;  %v828_v35 = vadd.f32 %v826_v30, %v806_v41  ;;  %v856_v34 = vsel %vm195_vm4, %v855_v57, %v1844_v3 }
 0x14c   :  { %v412_v1 = vsel %vm411_vm7, %v406_v6, %v408_v62  ;;  %v417_v9 = vsel %vm258_vm10, %v413_v42, 0.0  ;;  %v838_v6 = vadd.f32 %v836_v60, %v817_v54 }
 0x14d   :  { %v416_v10 = vsel %vm257_vm11, %v412_v1, 0.0  ;;  %v419_v39 = vadd.f32 %v417_v9, %v252_v4  ;;  %v848_v1 = vadd.f32 %v846_v58, %v828_v35 }
 0x14e   :  { %v418_v12 = vadd.f32 %v416_v10, %v251_v40 }
 0x150   :  { %735 = vrot.lane.b32.xlu1 %v732_v20, %s1503_s5  ;;  %v858_v20 = vadd.f32 %v856_v34, %v838_v6  ;;  %s1377_s5 = sld [smem:[#allocation3 + $0x36]] }
 0x152   :  { %v575_v51 = vpop.permute.xlu2 %574 }
 0x156   :  { %v929_v33 = vstv %s1377_s5 }
 0x15a   :  { %v1879_v13 = vpop.permute.xlu2 %946 }
 0x15b   :  { %v948_v11 = vrot.slane %v1879_v13, 2 }
 0x15d   :  { %v949_v63 = vsel %vm109_vm0, %v1879_v13, %v948_v11 }
 0x162   :  { %v1895_v37 = vpop.permute.xlu2 %956 }
 0x16a   :  { %v573_v25 = vpop.permute.xlu1 %572  ;;  %v989_v62 = vpop.permute.xlu2 %988 }
 0x16b   :  { %v578_v27 = vsel %vm576_vm12, %v573_v25, %v575_v51  ;;  %v571_v28 = vpop.permute.xlu0 %570  ;;  %v990_v32 = vrot.slane %v989_v62, 6 }
 0x16c   :  { %v582_v29 = vsel %vm423_vm13, %v578_v27, 0.0  ;;  %v577_v31 = vsel %vm576_vm12, %v571_v28, %v573_v25  ;;  %v930_v28 = vmul.f32 %v929_v33, %v1766_v56 }
 0x16d   :  { %v1893_v36 = vadd.f32 %v582_v29, %v419_v39  ;;  %v581_v5 = vsel %vm422_vm14, %v577_v31, 0.0  ;;  %v958_v31 = vrot.slane %v1895_v37, 2  ;;  %v991_v54 = vsel %vm151_vm2, %v990_v32, %v989_v62 }
 0x16e   :  { %v1900_v38 = vadd.f32 %v581_v5, %v418_v12  ;;  %v951_v14 = vadd.f32 %v949_v63, %v930_v28 }
 0x16f   :  { %v959_v50 = vsel %vm130_vm1, %v1895_v37, %v958_v31 }
 0x172   :  { %v937_v49 = vpop.permute.xlu1 %936  ;;  %v1019_v17 = vpop.permute.xlu2 %1018 }
 0x173   :  { %v864_v53 = vpop.permute.xlu0 %863  ;;  %v938_v22 = vrot.slane %v937_v49, 2  ;;  %v1020_v57 = vrot.slane %v1019_v17, 6 }
 0x174   :  { %v865_v55 = vrot.slane %v864_v53, 6 }
 0x175   :  { %v939_v29 = vsel %vm109_vm0, %v937_v49, %v938_v22  ;;  %v1094_v22 = vstv %s1391_s17 }
 0x176   :  { %v866_v42 = vsel %vm195_vm4, %v865_v55, %v864_v53  ;;  %v941_v21 = vadd.f32 %v939_v29, %v925_v59  ;;  %v1095_v11 = vmul.f32 %v1094_v22, %v1840_v0  ;;  %v915_v22 = vadd.s32 2, %v1868_v47 }
 0x177   :  { %v868_v10 = vadd.f32 %v866_v42, %v848_v1 }
 0x178   :  { %v961_v30 = vadd.f32 %v959_v50, %v941_v21 }
 0x17a   :  { %v884_v4 = vpop.permute.xlu1 %883  ;;  %v1922_v26 = vpop.permute.xlu2 %1111 }
 0x17b   :  { %v885_v40 = vrot.slane %v884_v4, 6  ;;  %v874_v9 = vpop.permute.xlu0 %873 }
 0x17c   :  { %v875_v39 = vrot.slane %v874_v9, 6 }
 0x17d   :  { %v886_v12 = vsel %vm216_vm5, %v885_v40, %v884_v4  ;;  %v1021_v4 = vsel %vm195_vm4, %v1020_v57, %v1019_v17  ;;  %v1113_v17 = vrot.slane %v1922_v26, 2 }
 0x17e   :  { %v888_v7 = vadd.f32 %v886_v12, %v868_v10  ;;  %v876_v51 = vsel %vm216_vm5, %v875_v39, %v874_v9 }
 0x17f   :  { %v878_v2 = vadd.f32 %v876_v51, %v858_v20  ;;  %v1114_v59 = vsel %vm109_vm0, %v1922_v26, %v1113_v17 }
 0x180   :  { %v1116_v0 = vadd.f32 %v1114_v59, %v1095_v11 }
 0x181   :  { %v889_v16 = vadd.f32 %v888_v7, %v878_v2 }
 0x182   :  { %v978_v19 = vpop.permute.xlu1 %977  ;;  %v1122_v52 = vpop.permute.xlu2 %1121 }
 0x183   :  { %895 = vst [vmem:[#allocation1] ss:$4 sm:$0xff] %v889_v16  ;;  %v967_v3 = vpop.permute.xlu0 %966  ;;  %v979_v5 = vrot.slane %v978_v19, 6 }
 0x184   :  { %v968_v27 = vrot.slane %v967_v3, 2 }
 0x185   :  { %v980_v45 = vsel %vm151_vm2, %v979_v5, %v978_v19  ;;  %v1089_v19 = vstv %s1390_s16 }
 0x186   :  { %v969_v18 = vsel %vm130_vm1, %v967_v3, %v968_v27  ;;  %v982_v55 = vadd.f32 %v980_v45, %v961_v30  ;;  %v1090_v23 = vmul.f32 %v1089_v19, %v1837_v61  ;;  %v750_v19 = vadd.s32 1, %v1868_v47 }
 0x187   :  { %v971_v49 = vadd.f32 %v969_v18, %v951_v14 }
 0x189   :  { %v993_v35 = vadd.f32 %v991_v54, %v971_v49 }
 0x18a   :  { %v1009_v24 = vpop.permute.xlu1 %1008  ;;  %v898_v46 = vld.sshfl [vmem:[#allocation1 + $0x10] sm:$0xff pattern:$0x73625140]  ;;  %v897_v15 = vld.sshfl [vmem:[#allocation1 + $0x8] sm:$0xff pattern:$0x73625140]  ;;  %v1154_v39 = vpop.permute.xlu2 %1153 }
 0x18b   :  { %v999_v25 = vpop.permute.xlu0 %998  ;;  %903 = vrot.lane.b32.xlu0 %v898_v46, %s1508_s8  ;;  %901 = vrot.lane.b32.xlu2 %v897_v15, %s1508_s8  ;;  %v896_v43 = vld.sshfl [vmem:[#allocation1] sm:$0xff pattern:$0x73625140]  ;;  %v1010_v56 = vrot.slane %v1009_v24, 6  ;;  %v1123_v15 = vrot.slane %v1122_v52, 2  ;;  %v1155_v14 = vrot.slane %v1154_v39, 6 }
 0x18c   :  { %v1000_v8 = vrot.slane %v999_v25, 6 }
 0x18d   :  { %v1011_v37 = vsel %vm173_vm3, %v1010_v56, %v1009_v24  ;;  %v1124_v5 = vsel %vm130_vm1, %v1122_v52, %v1123_v15 }
 0x18e   :  { %v1001_v53 = vsel %vm173_vm3, %v1000_v8, %v999_v25  ;;  %v1013_v6 = vadd.f32 %v1011_v37, %v993_v35 }
 0x18f   :  { %v1003_v60 = vadd.f32 %v1001_v53, %v982_v55 }
 0x191   :  { %v1023_v62 = vadd.f32 %v1021_v4, %v1003_v60 }
 0x192   :  { %v1102_v44 = vpop.permute.xlu1 %1101  ;;  %v1184_v24 = vpop.permute.xlu2 %1183 }
 0x193   :  { %v1029_v41 = vpop.permute.xlu0 %1028  ;;  %899 = vrot.lane.b32.xlu2 %v896_v43, %s1508_s8  ;;  %v1103_v3 = vrot.slane %v1102_v44, 2  ;;  %v1185_v45 = vrot.slane %v1184_v24, 6 }
 0x194   :  { %v1030_v13 = vrot.slane %v1029_v41, 6 }
 0x195   :  { %v1104_v46 = vsel %vm109_vm0, %v1102_v44, %v1103_v3  ;;  %v1186_v35 = vsel %vm195_vm4, %v1185_v45, %v1184_v24  ;;  %v914_v3 = vadd.s32 2, %v1870_v48  ;;  %vm1070_vm0 = vcmask 375808  }
 0x196   :  { %v1031_v58 = vsel %vm195_vm4, %v1030_v13, %v1029_v41  ;;  %v1106_v31 = vadd.f32 %v1104_v46, %v1090_v23  ;;  %v1156_v41 = vsel %vm151_vm2, %v1155_v14, %v1154_v39 }
 0x197   :  { %v1033_v40 = vadd.f32 %v1031_v58, %v1013_v6 }
 0x198   :  { %v1126_v8 = vadd.f32 %v1124_v5, %v1106_v31 }
 0x19a   :  { %v1049_v42 = vpop.permute.xlu1 %1048  ;;  %v1214_v56 = vpop.permute.xlu2 %1213 }
 0x19b   :  { %v1050_v34 = vrot.slane %v1049_v42, 6  ;;  %v1039_v1 = vpop.permute.xlu0 %1038  ;;  %v1215_v55 = vrot.slane %v1214_v56, 6 }
 0x19c   :  { %v1040_v9 = vrot.slane %v1039_v1, 6 }
 0x19d   :  { %v1051_v10 = vsel %vm216_vm5, %v1050_v34, %v1049_v42  ;;  %v1216_v34 = vsel %vm216_vm5, %v1215_v55, %v1214_v56 }
 0x19e   :  { %v1053_v12 = vadd.f32 %v1051_v10, %v1033_v40  ;;  %v1041_v20 = vsel %vm216_vm5, %v1040_v9, %v1039_v1 }
 0x19f   :  { %v1043_v7 = vadd.f32 %v1041_v20, %v1023_v62 }
 0x1a1   :  { %v1054_v51 = vadd.f32 %v1053_v12, %v1043_v7 }
 0x1a2   :  { %v1143_v2 = vpop.permute.xlu1 %1142 }
 0x1a3   :  { %1060 = vst [vmem:[#allocation1] ss:$4 sm:$0xff] %v1054_v51  ;;  %v1132_v16 = vpop.permute.xlu0 %1131  ;;  %v1144_v25 = vrot.slane %v1143_v2, 6 }
 0x1a4   :  { %v1133_v33 = vrot.slane %v1132_v16, 2 }
 0x1a5   :  { %v1145_v50 = vsel %vm151_vm2, %v1144_v25, %v1143_v2  ;;  %vm754_vm2 = vcmp.le.s32.totalorder %v750_v19, 15 }
 0x1a6   :  { %v1134_v21 = vsel %vm130_vm1, %v1132_v16, %v1133_v33  ;;  %v1147_v32 = vadd.f32 %v1145_v50, %v1126_v8  ;;  %v749_v16 = vadd.s32 1, %v1870_v48 }
 0x1a7   :  { %v1136_v44 = vadd.f32 %v1134_v21, %v1116_v0 }
 0x1a8   :  { %vm753_vm1 = vcmp.le.s32.totalorder %v749_v16, 15 }
 0x1a9   :  { %v1158_v13 = vadd.f32 %v1156_v41, %v1136_v44 }
 0x1aa   :  { %v1174_v27 = vpop.permute.xlu1 %1173  ;;  %v1063_v28 = vld.sshfl [vmem:[#allocation1 + $0x10] sm:$0xff pattern:$0x73625140]  ;;  %v1062_v29 = vld.sshfl [vmem:[#allocation1 + $0x8] sm:$0xff pattern:$0x73625140] }
 0x1ab   :  { %v1164_v63 = vpop.permute.xlu0 %1163  ;;  %1068 = vrot.lane.b32.xlu1 %v1063_v28, %s1509_s0  ;;  %1066 = vrot.lane.b32.xlu0 %v1062_v29, %s1509_s0  ;;  %v1061_v61 = vld.sshfl [vmem:[#allocation1] sm:$0xff pattern:$0x73625140]  ;;  %v1175_v26 = vrot.slane %v1174_v27, 6  ;;  %v1080_v28 = vadd.s32 3, %v1868_v47 }
 0x1ac   :  { %v1165_v18 = vrot.slane %v1164_v63, 6  ;;  %1064 = vrot.lane.b32.xlu2 %v1061_v61, %s1509_s0 }
 0x1ad   :  { %v1176_v49 = vsel %vm173_vm3, %v1175_v26, %v1174_v27  ;;  %v1079_v27 = vadd.s32 3, %v1870_v48  ;;  %vm1084_vm7 = vcmp.le.s32.totalorder %v1080_v28, 15 }
 0x1ae   :  { %v1166_v43 = vsel %vm173_vm3, %v1165_v18, %v1164_v63  ;;  %v1178_v57 = vadd.f32 %v1176_v49, %v1158_v13  ;;  %vm918_vm3 = vcmp.le.s32.totalorder %v914_v3, 15 }
 0x1af   :  { %v1168_v52 = vadd.f32 %v1166_v43, %v1147_v32 }
 0x1b1   :  { %v1188_v6 = vadd.f32 %v1186_v35, %v1168_v52 }
 0x1b2   :  { %v1204_v30 = vpop.permute.xlu1 %1203 }
 0x1b3   :  { %v1205_v53 = vrot.slane %v1204_v30, 6  ;;  %v1194_v54 = vpop.permute.xlu0 %1193 }
 0x1b4   :  { %v1195_v37 = vrot.slane %v1194_v54, 6 }
 0x1b5   :  { %v1206_v60 = vsel %vm216_vm5, %v1205_v53, %v1204_v30  ;;  %vm919_vm5 = vcmp.le.s32.totalorder %v915_v22, 15 }
 0x1b6   :  { %v1196_v58 = vsel %vm195_vm4, %v1195_v37, %v1194_v54  ;;  %v1208_v1 = vadd.f32 %v1206_v60, %v1188_v6 }
 0x1b7   :  { %v1198_v42 = vadd.f32 %v1196_v58, %v1178_v57 }
 0x1b9   :  { %v1218_v4 = vadd.f32 %v1216_v34, %v1198_v42 }
 0x1ba   :  { %v740_v12 = vpop.permute.xlu1 %739 }
 0x1bb   :  { %v1219_v40 = vadd.f32 %v1218_v4, %v1208_v1  ;;  %v738_v20 = vpop.permute.xlu0 %737 }
 0x1bc   :  { %v742_v33 = vsel %vm195_vm4, %v738_v20, %v740_v12 }
 0x1bd   :  { %1225 = vst [vmem:[#allocation1] ss:$4 sm:$0xff] %v1219_v40  ;;  %v748_v63 = vadd.f32 %v742_v33, %v1893_v36 }
 0x1c2   :  { %v736_v51 = vpop.permute.xlu1 %735 }
 0x1c3   :  { %v741_v11 = vsel %vm195_vm4, %v736_v51, %v738_v20  ;;  %vm1083_vm4 = vcmp.le.s32.totalorder %v1079_v27, 15 }
 0x1c4   :  { %v1228_v9 = vld.sshfl [vmem:[#allocation1 + $0x10] sm:$0xff pattern:$0x73625140]  ;;  %v1227_v10 = vld.sshfl [vmem:[#allocation1 + $0x8] sm:$0xff pattern:$0x73625140]  ;;  %v747_v61 = vadd.f32 %v741_v11, %v1900_v38 }
 0x1c5   :  { %1233 = vrot.lane.b32.xlu1 %v1228_v9, %s1510_s1  ;;  %1231 = vrot.lane.b32.xlu0 %v1227_v10, %s1510_s1  ;;  %v1226_v62 = vld.sshfl [vmem:[#allocation1] sm:$0xff pattern:$0x73625140] }
 0x1c6   :  { %1229 = vrot.lane.b32.xlu2 %v1226_v62, %s1510_s1 }
 0x1e5   :  { %v902_v39 = vpop.permute.xlu2 %901 }
 0x1ed   :  { %v900_v7 = vpop.permute.xlu2 %899 }
 0x1ee   :  { %v906_v46 = vsel %vm905_vm15, %v900_v7, %v902_v39 }
 0x1ef   :  { %v910_v29 = vsel %vm753_vm1, %v906_v46, 0.0 }
 0x1f0   :  { %v912_v18 = vadd.f32 %v910_v29, %v747_v61 }
 0x1fd   :  { %v904_v2 = vpop.permute.xlu0 %903 }
 0x1fe   :  { %v907_v15 = vsel %vm905_vm15, %v902_v39, %v904_v2  ;;  %vm1285_vm15 = vcmask 1041408  }
 0x1ff   :  { %v911_v31 = vsel %vm754_vm2, %v907_v15, 0.0 }
 0x200   :  { %v913_v0 = vadd.f32 %v911_v31, %v748_v63 }
 0x206   :  { %v1065_v17 = vpop.permute.xlu2 %1064 }
 0x21d   :  { %v1069_v23 = vpop.permute.xlu1 %1068  ;;  %v1067_v24 = vpop.permute.xlu0 %1066 }
 0x21e   :  { %v1071_v25 = vsel %vm1070_vm0, %v1065_v17, %v1067_v24  ;;  %v1072_v59 = vsel %vm1070_vm0, %v1067_v24, %v1069_v23 }
 0x21f   :  { %v1075_v5 = vsel %vm918_vm3, %v1071_v25, 0.0  ;;  %v1076_v21 = vsel %vm919_vm5, %v1072_v59, 0.0 }
 0x220   :  { %v1230_v14 = vpop.permute.xlu2 %1229  ;;  %v1077_v8 = vadd.f32 %v1075_v5, %v912_v18  ;;  %v1078_v48 = vadd.f32 %v1076_v21, %v913_v0 }
 0x237   :  { %v1234_v50 = vpop.permute.xlu1 %1233  ;;  %v1232_v26 = vpop.permute.xlu0 %1231 }
 0x238   :  { %v1236_v44 = vsel %vm1235_vm6, %v1230_v14, %v1232_v26  ;;  %v1237_v47 = vsel %vm1235_vm6, %v1232_v26, %v1234_v50 }
 0x239   :  { %v1240_v43 = vsel %vm1083_vm4, %v1236_v44, 0.0  ;;  %v1241_v32 = vsel %vm1084_vm7, %v1237_v47, 0.0 }
 0x23a   :  { %v1242_v56 = vadd.f32 %v1240_v43, %v1077_v8  ;;  %v1243_v36 = vadd.f32 %v1241_v32, %v1078_v48 }
 0x23c   :  { %v1404_v41 = vmul.f32 -1.442695, %v1242_v56  ;;  %v1405_v38 = vmul.f32 -1.442695, %v1243_v36 }
 0x23e   :  { %1422 = vpow2.f32 %v1404_v41 }
 0x23f   :  { %1424 = vpow2.f32 %v1405_v38 }
 0x244   :  { %v1423_v45 = vpop.eup %1422 }
 0x245   :  { %v1425_v49 = vpop.eup %1424  ;;  %v1250_v30 = vadd.f32 1.0, %v1423_v45 }
 0x246   :  { %v1251_v13 = vadd.f32 1.0, %v1425_v49 }
 0x247   :  { %1426 = vrcp.f32 %v1250_v30  ;;  %vm1257_vm10 = vweird.f32 %v1250_v30  ;;  %v1263_v34 = vand.u32 2147483648, %v1250_v30  ;;  %v1261_v4 = vand.u32 2147483647, %v1250_v30 }
 0x248   :  { %1428 = vrcp.f32 %v1251_v13  ;;  %v1278_v60 = vand.u32 2147483648, %v1251_v13  ;;  %v1276_v6 = vand.u32 2147483647, %v1251_v13  ;;  %vm1272_vm12 = vweird.f32 %v1251_v13 }
 0x249   :  { %v1264_v39 = vor.u32 1.1754944e-38, %v1263_v34  ;;  %vm1262_vm0 = vcmp.eq.f32.partialorder %v1261_v4, 8.507059e+37 }
 0x24a   :  { %v1279_v9 = vor.u32 1.1754944e-38, %v1278_v60  ;;  %vm1277_vm14 = vcmp.eq.f32.partialorder %v1276_v6, 8.507059e+37 }
 0x24d   :  { %v1427_v52 = vpop.eup %1426 }
 0x24e   :  { %v1429_v53 = vpop.eup %1428  ;;  %v1253_v54 = vmul.f32 %v1427_v52, %v1250_v30  ;;  %vm1258_vm8 = vweird.f32 %v1427_v52 }
 0x24f   :  { %v1268_v55 = vmul.f32 %v1429_v53, %v1251_v13  ;;  %vm1273_vm9 = vweird.f32 %v1429_v53  ;;  %vm1967_vm11 = vmor %vm1257_vm10, %vm1258_vm8 }
 0x250   :  { %v1254_v37 = vsub.f32 1.0, %v1253_v54  ;;  %vm1274_vm13 = vmor %vm1272_vm12, %vm1273_vm9 }
 0x251   :  { %v1269_v57 = vsub.f32 1.0, %v1268_v55 }
 0x252   :  { %v1255_v35 = vmul.f32 %v1427_v52, %v1254_v37 }
 0x253   :  { %v1270_v58 = vmul.f32 %v1429_v53, %v1269_v57 }
 0x254   :  { %v1256_v42 = vadd.f32 %v1427_v52, %v1255_v35 }
 0x255   :  { %v1271_v40 = vadd.f32 %v1429_v53, %v1270_v58 }
 0x256   :  { %v1260_v10 = vsel %vm1967_vm11, %v1427_v52, %v1256_v42 }
 0x257   :  { %v1275_v62 = vsel %vm1274_vm13, %v1429_v53, %v1271_v40  ;;  %v1265_v7 = vsel %vm1262_vm0, %v1264_v39, %v1260_v10 }
 0x258   :  { %v1280_v12 = vsel %vm1277_vm14, %v1279_v9, %v1275_v62 }
 0x259   :  { %v1284_v20 = vrot.slane %v1280_v12, 6 }
 0x25b   :  { %v1286_v51 = vsel %vm1285_vm15, %v1265_v7, %v1284_v20 }
 0x25c   :  { %1288 = vst [vmem:[#allocation8] sm:$0xf] %v1286_v51 }
 0x25d   :  { %1299 = dma.vmem_to_hbm [thread:$0]  %s1295_s19, 64, %s1297_s24, [#allocation5]  }
 0x25e   :  { %1494 = dma.done.wait [#allocation5], 64  }
 0x25f   :  { %1495 = vsyncadd [#allocation5], 4294967232 }
 0x260   :  { %1304 = vsyncpa [#allocation4], 1 }
 0x261   :  { %1305 = vsyncpa [#allocation5], 1 }
 0x262   :  { %1306 = vsyncpa [#allocation6], 1 }

</bundles_post_ra>
